<compile_context>
chip_gen: v5e
topology: v5e:2x2
jax: 0.10.0
libtpu: 0.0.40
codegen_flags: <defaults>
</compile_context>

<pallas_src>
import functools

import jax
import jax.numpy as jnp
from jax.experimental import pallas as pl
from jax.experimental.pallas import tpu as pltpu


# ---------------------------------------------------------------------------
# Fused kernel: frontend + transformer backend + classifier (batch folded in rows)
# ---------------------------------------------------------------------------
def _pretrain_fused_kernel(
    cols_ref, wc_ref, cb_ref, pool_ref, pw_ref, pb_ref, pe_ref, mask_ref,
    wqkv_ref, bqkv_ref, wo_ref, bo_ref, ln1g_ref, ln1b_ref,
    w1_ref, b1_ref, w2_ref, b2_ref, ln2g_ref, ln2b_ref,
    ow_ref, ob_ref, o_ref, *, n_heads):
    f32, bf16 = jnp.float32, jnp.bfloat16
    R, D = pe_ref.shape                     # R = B*T tokens (batch folded into rows)
    L = bo_ref.shape[0]
    dh = D // n_heads

    # ---- VisualFrontend: Conv3d + ReLU as a TRANSPOSED bf16 GEMM (f32 accumulate).
    #      Output is the lane-dense (Cc, B*S) orientation.
    conv = jnp.dot(wc_ref[...], cols_ref[...], preferred_element_type=f32)   # (Cc, B*S)
    conv = jnp.maximum(conv + cb_ref[...], 0.0)
    # spatial mean-pool: single q@k.T-style contraction over the B*S lane axis
    pooled = jax.lax.dot_general(pool_ref[...], conv.astype(bf16),
                                 (((1,), (1,)), ((), ())),
                                 preferred_element_type=f32)                 # (R, Cc)
    feat = jnp.dot(pooled.astype(bf16), pw_ref[...],
                   preferred_element_type=f32) + pb_ref[...]
    feat = jnp.maximum(feat, 0.0)                                            # (R, D)

    # ---- TransformerBackend: sinusoidal PE + post-norm encoder layers ----
    h = feat + pe_ref[...]                                                   # f32

    def layernorm(z, g, b):                 # f32 VPU/EUP math (v5e-safe)
        mu = jnp.mean(z, axis=-1, keepdims=True)
        zc = z - mu
        var = jnp.mean(zc * zc, axis=-1, keepdims=True)
        return zc * jax.lax.rsqrt(var + 1e-5) * g + b

    # additive block-diagonal mask: every T consecutive stacked rows share one
    # (head, batch) attention block, so one score matmul covers all heads/batches.
    mask = mask_ref[...]                                                     # (H*R, H*R)

    for l in range(L):                      # static unroll, weights VMEM-resident
        bqkv = bqkv_ref[l]
        bo = bo_ref[l]
        ln1g, ln1b = ln1g_ref[l], ln1b_ref[l]
        ln2g, ln2b = ln2g_ref[l], ln2b_ref[l]
        b1, b2 = b1_ref[l], b2_ref[l]

        # fused QKV projection (1/sqrt(dh) pre-folded into the Q block at pack time)
        qkv = jnp.dot(h.astype(bf16), wqkv_ref[l], preferred_element_type=f32) + bqkv

        # restack heads onto sublanes: (R, H*dh) -> (H*R, dh)
        q_s = jnp.concatenate([qkv[:, i * dh:(i + 1) * dh]
                               for i in range(n_heads)], axis=0)
        k_s = jnp.concatenate([qkv[:, D + i * dh:D + (i + 1) * dh]
                               for i in range(n_heads)], axis=0)
        v_s = jnp.concatenate([qkv[:, 2 * D + i * dh:2 * D + (i + 1) * dh]
                               for i in range(n_heads)], axis=0)

        # ONE masked score matmul + ONE PV matmul for all heads and batches
        s = jax.lax.dot_general(q_s.astype(bf16), k_s.astype(bf16),
                                (((1,), (1,)), ((), ())),
                                preferred_element_type=f32) + mask           # (H*R, H*R)
        s = s - jnp.max(s, axis=-1, keepdims=True)
        p = jnp.exp(s)
        p = p * pl.reciprocal(jnp.sum(p, axis=-1, keepdims=True), approx=True)
        o_s = jnp.dot(p.astype(bf16), v_s.astype(bf16),
                      preferred_element_type=f32)                            # (H*R, dh)

        # per-head slices of the output projection: sublane-aligned row slices of o_s
        # (avoids a non-128-aligned lane concatenation), summed into attn.
        attn = bo
        for i in range(n_heads):
            attn = attn + jnp.dot(o_s[i * R:(i + 1) * R, :].astype(bf16),
                                  wo_ref[l * n_heads + i],
                                  preferred_element_type=f32)                # (R, D)

        h = layernorm(h + attn, ln1g, ln1b)                  # residual fused into LN
        ff = jnp.maximum(jnp.dot(h.astype(bf16), w1_ref[l],
                                 preferred_element_type=f32) + b1, 0.0)
        ff = jnp.dot(ff.astype(bf16), w2_ref[l], preferred_element_type=f32) + b2
        h = layernorm(h + ff, ln2g, ln2b)

    # ---- classifier: single lane-dense (padded to 512 lanes) HBM store ----
    o_ref[...] = jnp.dot(h.astype(bf16), ow_ref[...],
                         preferred_element_type=f32) + ob_ref[...]


# ---------------------------------------------------------------------------
# Glue: transposed im2col, positional encoding, parameter init / packing
# ---------------------------------------------------------------------------
def im2col_3d_transposed(x, ksize, stride, pad):
    """x: (B, T, H, W) single-channel video -> (B, K, To*Ho*Wo).
    K = kt*kh*kw is already the contraction (sublane) axis; no big transposes."""
    B, T, H, W = x.shape
    kt, kh, kw = ksize
    st, sh, sw = stride
    pt, ph, pw = pad
    xp = jnp.pad(x, ((0, 0), (pt, pt), (ph, ph), (pw, pw)))
    To = (T + 2 * pt - kt) // st + 1
    Ho = (H + 2 * ph - kh) // sh + 1
    Wo = (W + 2 * pw - kw) // sw + 1
    rows = []
    for it in range(kt):
        for ih in range(kh):
            for iw in range(kw):
                rows.append(
                    xp[:, it:it + To * st:st, ih:ih + Ho * sh:sh, iw:iw + Wo * sw:sw]
                    .reshape(B, To * Ho * Wo))
    return jnp.stack(rows, axis=1), (To, Ho, Wo)            # (B, K, S)


def sinusoidal_pe(T, D):
    pos = jnp.arange(T, dtype=jnp.float32)[:, None]
    i = jnp.arange(0, D, 2, dtype=jnp.float32)
    angle = pos / jnp.power(10000.0, i / D)
    pe = jnp.zeros((T, D), jnp.float32)
    pe = pe.at[:, 0::2].set(jnp.sin(angle))
    pe = pe.at[:, 1::2].set(jnp.cos(angle))
    return pe


def init_params(key, num_classes, conv_c=8, d_model=32, n_heads=4, d_ff=64, n_layers=2):
    def nrm(k, shape, scale=0.02):
        return scale * jax.random.normal(k, shape, jnp.float32)

    keys = iter(jax.random.split(key, 64))
    p = {
        "conv_w": nrm(next(keys), (conv_c, 1, 3, 5, 5), 0.1),
        "conv_b": jnp.zeros((conv_c,), jnp.float32),
        "proj_w": nrm(next(keys), (conv_c, d_model)),
        "proj_b": jnp.zeros((d_model,), jnp.float32),
        "out_w": nrm(next(keys), (d_model, num_classes)),
        "out_b": jnp.zeros((num_classes,), jnp.float32),
        "layers": [],
    }
    for _ in range(n_layers):
        p["layers"].append({
            "wq": nrm(next(keys), (d_model, d_model)), "bq": jnp.zeros((d_model,), jnp.float32),
            "wk": nrm(next(keys), (d_model, d_model)), "bk": jnp.zeros((d_model,), jnp.float32),
            "wv": nrm(next(keys), (d_model, d_model)), "bv": jnp.zeros((d_model,), jnp.float32),
            "wo": nrm(next(keys), (d_model, d_model)), "bo": jnp.zeros((d_model,), jnp.float32),
            "ln1_g": jnp.ones((d_model,), jnp.float32), "ln1_b": jnp.zeros((d_model,), jnp.float32),
            "w1": nrm(next(keys), (d_model, d_ff)), "b1": jnp.zeros((d_ff,), jnp.float32),
            "w2": nrm(next(keys), (d_ff, d_model)), "b2": jnp.zeros((d_model,), jnp.float32),
            "ln2_g": jnp.ones((d_model,), jnp.float32), "ln2_b": jnp.zeros((d_model,), jnp.float32),
        })
    return p


def pack_params(p, n_heads=4):
    """Pack PyTorch-layout params into kernel-ready bf16 stacked / padded tensors (once)."""
    bf16 = jnp.bfloat16
    conv_c = p["conv_w"].shape[0]
    wc = p["conv_w"].reshape(conv_c, -1)                  # (Cc, K=75): (Cout, Cin*kt*kh*kw)
    K = wc.shape[1]
    Kp = ((K + 127) // 128) * 128                         # 75 -> 128, tile-aligned contraction
    wc_t = jnp.pad(wc, ((0, 0), (0, Kp - K))).astype(bf16)

    D = p["proj_w"].shape[1]
    dh = D // n_heads
    V = p["out_w"].shape[1]
    Vp = ((V + 127) // 128) * 128                         # 500 -> 512, lane-dense store
    scale = 1.0 / float(dh) ** 0.5

    L = p["layers"]

    def qkv_w(l):      # (D, 3D); attention scale folded into the Q block (scores only)
        return jnp.concatenate([l["wq"] * scale, l["wk"], l["wv"]], axis=1)

    def qkv_b(l):      # (1, 3D)
        return jnp.concatenate([l["bq"] * scale, l["bk"], l["bv"]])[None]

    def heads_out(w):  # (D, D) -> (H, dh, D): head h owns input rows [h*dh:(h+1)*dh]
        return jnp.stack([w[h * dh:(h + 1) * dh, :] for h in range(n_heads)])

    packed = {
        "wc_t": wc_t,                                             # (Cc, Kp)   bf16
        "cb": p["conv_b"][:, None],                               # (Cc, 1)    f32
        "proj_w": p["proj_w"].astype(bf16),                       # (Cc, D)    bf16
        "proj_b": p["proj_b"][None],                              # (1, D)     f32
        "wqkv": jnp.stack([qkv_w(l) for l in L]).astype(bf16),    # (L, D, 3D) bf16
        "bqkv": jnp.stack([qkv_b(l) for l in L]),                 # (L, 1, 3D) f32
        "wo": jnp.concatenate([heads_out(l["wo"]) for l in L]).astype(bf16),  # (L*H, dh, D)
        "bo": jnp.stack([l["bo"][None] for l in L]),              # (L, 1, D)
        "ln1g": jnp.stack([l["ln1_g"][None] for l in L]),
        "ln1b": jnp.stack([l["ln1_b"][None] for l in L]),
        "w1": jnp.stack([l["w1"] for l in L]).astype(bf16),       # (L, D, F)  bf16
        "b1": jnp.stack([l["b1"][None] for l in L]),              # (L, 1, F)
        "w2": jnp.stack([l["w2"] for l in L]).astype(bf16),       # (L, F, D)  bf16
        "b2": jnp.stack([l["b2"][None] for l in L]),
        "ln2g": jnp.stack([l["ln2_g"][None] for l in L]),
        "ln2b": jnp.stack([l["ln2_b"][None] for l in L]),
        "out_w": jnp.pad(p["out_w"], ((0, 0), (0, Vp - V))).astype(bf16),     # (D, Vp)
        "out_b": jnp.pad(p["out_b"], (0, Vp - V))[None],                      # (1, Vp)
    }
    return packed


# ---------------------------------------------------------------------------
# PretrainNet.forward
# ---------------------------------------------------------------------------
def pretrain_net_forward(packed, x, *, num_classes, n_heads=4):
    B, T, H, W = x.shape
    bf16 = jnp.bfloat16

    # frontend glue (x.unsqueeze(1): Cin=1 is implicit).  bf16-first so every im2col
    # intermediate is half-width; K is already the contraction (sublane) axis.
    cols_t, (To, Ho, Wo) = im2col_3d_transposed(
        x.astype(bf16), (3, 5, 5), (1, 2, 2), (1, 2, 2))
    assert To == T, (To, T)                               # temporal conv is length-preserving
    S = To * Ho * Wo
    Kp = packed["wc_t"].shape[1]
    cols_t = jnp.pad(cols_t, ((0, 0), (0, Kp - cols_t.shape[1]), (0, 0)))   # (B, Kp, S) bf16
    cols_t = jnp.transpose(cols_t, (1, 0, 2)).reshape(Kp, B * S)            # (Kp, B*S)

    D = packed["proj_w"].shape[1]
    Vp = packed["out_w"].shape[1]
    R = B * T                                             # batch folded into the row axis
    N = n_heads * R

    # compile-time constants: pooling matrix (bf16, 1/64 exact), PE tiled over batch,
    # additive block-diagonal attention mask (row blocks of T share one (head, batch)).
    pool = (jnp.repeat(jnp.eye(R, dtype=jnp.float32), Ho * Wo, axis=1)
            / (Ho * Wo)).astype(bf16)                                        # (R, B*S)
    pe_all = jnp.tile(sinusoidal_pe(T, D), (B, 1))                           # (R, D)
    blk = jnp.arange(N, dtype=jnp.int32) // T
    attn_mask = jnp.where(blk[:, None] == blk[None, :], 0.0, -1e30).astype(jnp.float32)

    vmem = pl.BlockSpec(memory_space=pltpu.MemorySpace.VMEM)
    kernel = functools.partial(_pretrain_fused_kernel, n_heads=n_heads)

    logits = pl.pallas_call(
        kernel,
        out_shape=jax.ShapeDtypeStruct((R, Vp), jnp.float32),
        in_specs=[vmem] * 22,
        out_specs=vmem,
    )(cols_t, packed["wc_t"], packed["cb"], pool, packed["proj_w"], packed["proj_b"],
      pe_all, attn_mask,
      packed["wqkv"], packed["bqkv"], packed["wo"], packed["bo"],
      packed["ln1g"], packed["ln1b"], packed["w1"], packed["b1"],
      packed["w2"], packed["b2"], packed["ln2g"], packed["ln2b"],
      packed["out_w"], packed["out_b"])

    # TODO(synk): original VisualFrontend applies a ResNet trunk after the 3-D conv; its
    # definition is not in the snippet, replaced by spatial mean-pool + linear projection.
    # TODO(synk): ConvolutionalBackend(nh, 500) definition is not in the snippet; the
    # reviewed transformer-style encoder backend is kept (500-way head).
    return logits.reshape(B, T, Vp)[:, :, :num_classes]   # strip lane padding


if __name__ == "__main__":
    key = jax.random.PRNGKey(0)
    kx, kp = jax.random.split(key)
    B, T, H, W = 2, 8, 16, 16
    num_classes = 500                      # ConvolutionalBackend(nh, 500)
    n_heads = 4

    x = jax.random.normal(kx, (B, T, H, W), jnp.float32)
    params = init_params(kp, num_classes, n_heads=n_heads)
    packed = pack_params(params, n_heads=n_heads)

    fwd = jax.jit(functools.partial(pretrain_net_forward,
                                    num_classes=num_classes, n_heads=n_heads))
    out = jax.block_until_ready(fwd(packed, x))

    assert out.shape == (B, T, num_classes), out.shape
    assert bool(jnp.all(jnp.isfinite(out)))
    print("KERNEL_OK")
</pallas_src>

<mosaic_0001>
module attributes {stable_mosaic.version = 11 : i64} {
  func.func @_pretrain_fused_kernel(%arg0: memref<128x1024xbf16, #tpu.memory_space<vmem>>, %arg1: memref<8x128xbf16, #tpu.memory_space<vmem>>, %arg2: memref<8x1xf32, #tpu.memory_space<vmem>>, %arg3: memref<16x1024xbf16, #tpu.memory_space<vmem>>, %arg4: memref<8x32xbf16, #tpu.memory_space<vmem>>, %arg5: memref<1x32xf32, #tpu.memory_space<vmem>>, %arg6: memref<16x32xf32, #tpu.memory_space<vmem>>, %arg7: memref<64x64xf32, #tpu.memory_space<vmem>>, %arg8: memref<2x32x96xbf16, #tpu.memory_space<vmem>>, %arg9: memref<2x1x96xf32, #tpu.memory_space<vmem>>, %arg10: memref<8x8x32xbf16, #tpu.memory_space<vmem>>, %arg11: memref<2x1x32xf32, #tpu.memory_space<vmem>>, %arg12: memref<2x1x32xf32, #tpu.memory_space<vmem>>, %arg13: memref<2x1x32xf32, #tpu.memory_space<vmem>>, %arg14: memref<2x32x64xbf16, #tpu.memory_space<vmem>>, %arg15: memref<2x1x64xf32, #tpu.memory_space<vmem>>, %arg16: memref<2x64x32xbf16, #tpu.memory_space<vmem>>, %arg17: memref<2x1x32xf32, #tpu.memory_space<vmem>>, %arg18: memref<2x1x32xf32, #tpu.memory_space<vmem>>, %arg19: memref<2x1x32xf32, #tpu.memory_space<vmem>>, %arg20: memref<32x512xbf16, #tpu.memory_space<vmem>>, %arg21: memref<1x512xf32, #tpu.memory_space<vmem>>, %arg22: memref<16x512xf32, #tpu.memory_space<vmem>>) attributes {dimension_semantics = [], scalar_prefetch = 0 : i64, scratch_operands = 0 : i64, tpu.core_type = #tpu.core_type<tc>} {
    %c0 = arith.constant 0 : index
    %c0_0 = arith.constant 0 : index
    %0 = vector.load %arg1[%c0, %c0_0] : memref<8x128xbf16, #tpu.memory_space<vmem>>, vector<8x128xbf16>
    %c0_1 = arith.constant 0 : index
    %c0_2 = arith.constant 0 : index
    %1 = vector.load %arg0[%c0_1, %c0_2] : memref<128x1024xbf16, #tpu.memory_space<vmem>>, vector<128x1024xbf16>
    %cst = arith.constant dense<0.000000e+00> : vector<8x1024xf32>
    %2 = tpu.matmul %0, %1, %cst {dimension_numbers = #tpu.dot_dimension_numbers<[1], [0], [0], [1], [0, 0, 1, 1], [], []>} : vector<8x128xbf16>, vector<128x1024xbf16>, vector<8x1024xf32> -> vector<8x1024xf32>
    %c0_3 = arith.constant 0 : index
    %c0_4 = arith.constant 0 : index
    %3 = vector.load %arg2[%c0_3, %c0_4] : memref<8x1xf32, #tpu.memory_space<vmem>>, vector<8x1xf32>
    %4 = vector.broadcast %3 : vector<8x1xf32> to vector<8x1024xf32>
    %5 = arith.addf %2, %4 : vector<8x1024xf32>
    %cst_5 = arith.constant 0.000000e+00 : f32
    %6 = vector.broadcast %cst_5 : f32 to vector<8x1024xf32>
    %7 = arith.maximumf %5, %6 : vector<8x1024xf32>
    %c0_6 = arith.constant 0 : index
    %c0_7 = arith.constant 0 : index
    %8 = vector.load %arg3[%c0_6, %c0_7] : memref<16x1024xbf16, #tpu.memory_space<vmem>>, vector<16x1024xbf16>
    %9 = arith.truncf %7 : vector<8x1024xf32> to vector<8x1024xbf16>
    %cst_8 = arith.constant dense<0.000000e+00> : vector<16x8xf32>
    %10 = tpu.matmul %8, %9, %cst_8 {dimension_numbers = #tpu.dot_dimension_numbers<[1], [1], [0], [0], [0, 0, 1, 0], [], []>} : vector<16x1024xbf16>, vector<8x1024xbf16>, vector<16x8xf32> -> vector<16x8xf32>
    %11 = arith.truncf %10 : vector<16x8xf32> to vector<16x8xbf16>
    %c0_9 = arith.constant 0 : index
    %c0_10 = arith.constant 0 : index
    %12 = vector.load %arg4[%c0_9, %c0_10] : memref<8x32xbf16, #tpu.memory_space<vmem>>, vector<8x32xbf16>
    %cst_11 = arith.constant dense<0.000000e+00> : vector<16x32xf32>
    %13 = tpu.matmul %11, %12, %cst_11 {dimension_numbers = #tpu.dot_dimension_numbers<[1], [0], [0], [1], [0, 0, 1, 1], [], []>} : vector<16x8xbf16>, vector<8x32xbf16>, vector<16x32xf32> -> vector<16x32xf32>
    %c0_12 = arith.constant 0 : index
    %c0_13 = arith.constant 0 : index
    %14 = vector.load %arg5[%c0_12, %c0_13] : memref<1x32xf32, #tpu.memory_space<vmem>>, vector<1x32xf32>
    %15 = vector.broadcast %14 : vector<1x32xf32> to vector<16x32xf32>
    %16 = arith.addf %13, %15 : vector<16x32xf32>
    %cst_14 = arith.constant 0.000000e+00 : f32
    %17 = vector.broadcast %cst_14 : f32 to vector<16x32xf32>
    %18 = arith.maximumf %16, %17 : vector<16x32xf32>
    %c0_15 = arith.constant 0 : index
    %c0_16 = arith.constant 0 : index
    %19 = vector.load %arg6[%c0_15, %c0_16] : memref<16x32xf32, #tpu.memory_space<vmem>>, vector<16x32xf32>
    %20 = arith.addf %18, %19 : vector<16x32xf32>
    %c0_17 = arith.constant 0 : index
    %c0_18 = arith.constant 0 : index
    %21 = vector.load %arg7[%c0_17, %c0_18] : memref<64x64xf32, #tpu.memory_space<vmem>>, vector<64x64xf32>
    %c0_19 = arith.constant 0 : index
    %c0_20 = arith.constant 0 : index
    %c0_21 = arith.constant 0 : index
    %22 = vector.load %arg9[%c0_19, %c0_20, %c0_21] : memref<2x1x96xf32, #tpu.memory_space<vmem>>, vector<1x1x96xf32>
    %23 = vector.shape_cast %22 : vector<1x1x96xf32> to vector<1x96xf32>
    %c0_22 = arith.constant 0 : index
    %c0_23 = arith.constant 0 : index
    %c0_24 = arith.constant 0 : index
    %24 = vector.load %arg11[%c0_22, %c0_23, %c0_24] : memref<2x1x32xf32, #tpu.memory_space<vmem>>, vector<1x1x32xf32>
    %25 = vector.shape_cast %24 : vector<1x1x32xf32> to vector<1x32xf32>
    %c0_25 = arith.constant 0 : index
    %c0_26 = arith.constant 0 : index
    %c0_27 = arith.constant 0 : index
    %26 = vector.load %arg12[%c0_25, %c0_26, %c0_27] : memref<2x1x32xf32, #tpu.memory_space<vmem>>, vector<1x1x32xf32>
    %27 = vector.shape_cast %26 : vector<1x1x32xf32> to vector<1x32xf32>
    %c0_28 = arith.constant 0 : index
    %c0_29 = arith.constant 0 : index
    %c0_30 = arith.constant 0 : index
    %28 = vector.load %arg13[%c0_28, %c0_29, %c0_30] : memref<2x1x32xf32, #tpu.memory_space<vmem>>, vector<1x1x32xf32>
    %29 = vector.shape_cast %28 : vector<1x1x32xf32> to vector<1x32xf32>
    %c0_31 = arith.constant 0 : index
    %c0_32 = arith.constant 0 : index
    %c0_33 = arith.constant 0 : index
    %30 = vector.load %arg18[%c0_31, %c0_32, %c0_33] : memref<2x1x32xf32, #tpu.memory_space<vmem>>, vector<1x1x32xf32>
    %31 = vector.shape_cast %30 : vector<1x1x32xf32> to vector<1x32xf32>
    %c0_34 = arith.constant 0 : index
    %c0_35 = arith.constant 0 : index
    %c0_36 = arith.constant 0 : index
    %32 = vector.load %arg19[%c0_34, %c0_35, %c0_36] : memref<2x1x32xf32, #tpu.memory_space<vmem>>, vector<1x1x32xf32>
    %33 = vector.shape_cast %32 : vector<1x1x32xf32> to vector<1x32xf32>
    %c0_37 = arith.constant 0 : index
    %c0_38 = arith.constant 0 : index
    %c0_39 = arith.constant 0 : index
    %34 = vector.load %arg15[%c0_37, %c0_38, %c0_39] : memref<2x1x64xf32, #tpu.memory_space<vmem>>, vector<1x1x64xf32>
    %35 = vector.shape_cast %34 : vector<1x1x64xf32> to vector<1x64xf32>
    %c0_40 = arith.constant 0 : index
    %c0_41 = arith.constant 0 : index
    %c0_42 = arith.constant 0 : index
    %36 = vector.load %arg17[%c0_40, %c0_41, %c0_42] : memref<2x1x32xf32, #tpu.memory_space<vmem>>, vector<1x1x32xf32>
    %37 = vector.shape_cast %36 : vector<1x1x32xf32> to vector<1x32xf32>
    %38 = arith.truncf %20 : vector<16x32xf32> to vector<16x32xbf16>
    %c0_43 = arith.constant 0 : index
    %c0_44 = arith.constant 0 : index
    %c0_45 = arith.constant 0 : index
    %39 = vector.load %arg8[%c0_43, %c0_44, %c0_45] : memref<2x32x96xbf16, #tpu.memory_space<vmem>>, vector<1x32x96xbf16>
    %40 = vector.shape_cast %39 : vector<1x32x96xbf16> to vector<32x96xbf16>
    %cst_46 = arith.constant dense<0.000000e+00> : vector<16x96xf32>
    %41 = tpu.matmul %38, %40, %cst_46 {dimension_numbers = #tpu.dot_dimension_numbers<[1], [0], [0], [1], [0, 0, 1, 1], [], []>} : vector<16x32xbf16>, vector<32x96xbf16>, vector<16x96xf32> -> vector<16x96xf32>
    %42 = vector.broadcast %23 : vector<1x96xf32> to vector<16x96xf32>
    %43 = arith.addf %41, %42 : vector<16x96xf32>
    %44 = vector.extract_strided_slice %43 {offsets = [0, 0], sizes = [16, 8], strides = [1, 1]} : vector<16x96xf32> to vector<16x8xf32>
    %45 = vector.extract_strided_slice %43 {offsets = [0, 8], sizes = [16, 8], strides = [1, 1]} : vector<16x96xf32> to vector<16x8xf32>
    %46 = vector.extract_strided_slice %43 {offsets = [0, 16], sizes = [16, 8], strides = [1, 1]} : vector<16x96xf32> to vector<16x8xf32>
    %47 = vector.extract_strided_slice %43 {offsets = [0, 24], sizes = [16, 8], strides = [1, 1]} : vector<16x96xf32> to vector<16x8xf32>
    %48 = tpu.concatenate %44, %45, %46, %47 in 0 : vector<16x8xf32>, vector<16x8xf32>, vector<16x8xf32>, vector<16x8xf32> -> vector<64x8xf32>
    %49 = vector.extract_strided_slice %43 {offsets = [0, 32], sizes = [16, 8], strides = [1, 1]} : vector<16x96xf32> to vector<16x8xf32>
    %50 = vector.extract_strided_slice %43 {offsets = [0, 40], sizes = [16, 8], strides = [1, 1]} : vector<16x96xf32> to vector<16x8xf32>
    %51 = vector.extract_strided_slice %43 {offsets = [0, 48], sizes = [16, 8], strides = [1, 1]} : vector<16x96xf32> to vector<16x8xf32>
    %52 = vector.extract_strided_slice %43 {offsets = [0, 56], sizes = [16, 8], strides = [1, 1]} : vector<16x96xf32> to vector<16x8xf32>
    %53 = tpu.concatenate %49, %50, %51, %52 in 0 : vector<16x8xf32>, vector<16x8xf32>, vector<16x8xf32>, vector<16x8xf32> -> vector<64x8xf32>
    %54 = vector.extract_strided_slice %43 {offsets = [0, 64], sizes = [16, 8], strides = [1, 1]} : vector<16x96xf32> to vector<16x8xf32>
    %55 = vector.extract_strided_slice %43 {offsets = [0, 72], sizes = [16, 8], strides = [1, 1]} : vector<16x96xf32> to vector<16x8xf32>
    %56 = vector.extract_strided_slice %43 {offsets = [0, 80], sizes = [16, 8], strides = [1, 1]} : vector<16x96xf32> to vector<16x8xf32>
    %57 = vector.extract_strided_slice %43 {offsets = [0, 88], sizes = [16, 8], strides = [1, 1]} : vector<16x96xf32> to vector<16x8xf32>
    %58 = tpu.concatenate %54, %55, %56, %57 in 0 : vector<16x8xf32>, vector<16x8xf32>, vector<16x8xf32>, vector<16x8xf32> -> vector<64x8xf32>
    %59 = arith.truncf %48 : vector<64x8xf32> to vector<64x8xbf16>
    %60 = arith.truncf %53 : vector<64x8xf32> to vector<64x8xbf16>
    %cst_47 = arith.constant dense<0.000000e+00> : vector<64x64xf32>
    %61 = tpu.matmul %59, %60, %cst_47 {dimension_numbers = #tpu.dot_dimension_numbers<[1], [1], [0], [0], [0, 0, 1, 0], [], []>} : vector<64x8xbf16>, vector<64x8xbf16>, vector<64x64xf32> -> vector<64x64xf32>
    %62 = arith.addf %61, %21 : vector<64x64xf32>
    %cst_48 = arith.constant dense<0xFF800000> : vector<64xf32>
    %63 = vector.multi_reduction <maximumf>, %62, %cst_48 [1] : vector<64x64xf32> to vector<64xf32>
    %64 = vector.shape_cast %63 : vector<64xf32> to vector<64x1xf32>
    %65 = vector.broadcast %64 : vector<64x1xf32> to vector<64x64xf32>
    %66 = arith.subf %62, %65 : vector<64x64xf32>
    %67 = math.exp %66 : vector<64x64xf32>
    %cst_49 = arith.constant dense<0.000000e+00> : vector<64xf32>
    %68 = vector.multi_reduction <add>, %67, %cst_49 [1] : vector<64x64xf32> to vector<64xf32>
    %69 = vector.shape_cast %68 : vector<64xf32> to vector<64x1xf32>
    %70 = tpu.reciprocal %69 {approx = true} : vector<64x1xf32> -> vector<64x1xf32>
    %71 = vector.broadcast %70 : vector<64x1xf32> to vector<64x64xf32>
    %72 = arith.mulf %67, %71 : vector<64x64xf32>
    %73 = arith.truncf %72 : vector<64x64xf32> to vector<64x64xbf16>
    %74 = arith.truncf %58 : vector<64x8xf32> to vector<64x8xbf16>
    %cst_50 = arith.constant dense<0.000000e+00> : vector<64x8xf32>
    %75 = tpu.matmul %73, %74, %cst_50 {dimension_numbers = #tpu.dot_dimension_numbers<[1], [0], [0], [1], [0, 0, 1, 1], [], []>} : vector<64x64xbf16>, vector<64x8xbf16>, vector<64x8xf32> -> vector<64x8xf32>
    %76 = vector.extract_strided_slice %75 {offsets = [0, 0], sizes = [16, 8], strides = [1, 1]} : vector<64x8xf32> to vector<16x8xf32>
    %77 = arith.truncf %76 : vector<16x8xf32> to vector<16x8xbf16>
    %c0_51 = arith.constant 0 : index
    %c0_52 = arith.constant 0 : index
    %c0_53 = arith.constant 0 : index
    %78 = vector.load %arg10[%c0_51, %c0_52, %c0_53] : memref<8x8x32xbf16, #tpu.memory_space<vmem>>, vector<1x8x32xbf16>
    %79 = vector.shape_cast %78 : vector<1x8x32xbf16> to vector<8x32xbf16>
    %cst_54 = arith.constant dense<0.000000e+00> : vector<16x32xf32>
    %80 = tpu.matmul %77, %79, %cst_54 {dimension_numbers = #tpu.dot_dimension_numbers<[1], [0], [0], [1], [0, 0, 1, 1], [], []>} : vector<16x8xbf16>, vector<8x32xbf16>, vector<16x32xf32> -> vector<16x32xf32>
    %81 = vector.broadcast %25 : vector<1x32xf32> to vector<16x32xf32>
    %82 = arith.addf %81, %80 : vector<16x32xf32>
    %83 = vector.extract_strided_slice %75 {offsets = [16, 0], sizes = [16, 8], strides = [1, 1]} : vector<64x8xf32> to vector<16x8xf32>
    %84 = arith.truncf %83 : vector<16x8xf32> to vector<16x8xbf16>
    %c1 = arith.constant 1 : index
    %c0_55 = arith.constant 0 : index
    %c0_56 = arith.constant 0 : index
    %85 = vector.load %arg10[%c1, %c0_55, %c0_56] : memref<8x8x32xbf16, #tpu.memory_space<vmem>>, vector<1x8x32xbf16>
    %86 = vector.shape_cast %85 : vector<1x8x32xbf16> to vector<8x32xbf16>
    %cst_57 = arith.constant dense<0.000000e+00> : vector<16x32xf32>
    %87 = tpu.matmul %84, %86, %cst_57 {dimension_numbers = #tpu.dot_dimension_numbers<[1], [0], [0], [1], [0, 0, 1, 1], [], []>} : vector<16x8xbf16>, vector<8x32xbf16>, vector<16x32xf32> -> vector<16x32xf32>
    %88 = arith.addf %82, %87 : vector<16x32xf32>
    %89 = vector.extract_strided_slice %75 {offsets = [32, 0], sizes = [16, 8], strides = [1, 1]} : vector<64x8xf32> to vector<16x8xf32>
    %90 = arith.truncf %89 : vector<16x8xf32> to vector<16x8xbf16>
    %c2 = arith.constant 2 : index
    %c0_58 = arith.constant 0 : index
    %c0_59 = arith.constant 0 : index
    %91 = vector.load %arg10[%c2, %c0_58, %c0_59] : memref<8x8x32xbf16, #tpu.memory_space<vmem>>, vector<1x8x32xbf16>
    %92 = vector.shape_cast %91 : vector<1x8x32xbf16> to vector<8x32xbf16>
    %cst_60 = arith.constant dense<0.000000e+00> : vector<16x32xf32>
    %93 = tpu.matmul %90, %92, %cst_60 {dimension_numbers = #tpu.dot_dimension_numbers<[1], [0], [0], [1], [0, 0, 1, 1], [], []>} : vector<16x8xbf16>, vector<8x32xbf16>, vector<16x32xf32> -> vector<16x32xf32>
    %94 = arith.addf %88, %93 : vector<16x32xf32>
    %95 = vector.extract_strided_slice %75 {offsets = [48, 0], sizes = [16, 8], strides = [1, 1]} : vector<64x8xf32> to vector<16x8xf32>
    %96 = arith.truncf %95 : vector<16x8xf32> to vector<16x8xbf16>
    %c3 = arith.constant 3 : index
    %c0_61 = arith.constant 0 : index
    %c0_62 = arith.constant 0 : index
    %97 = vector.load %arg10[%c3, %c0_61, %c0_62] : memref<8x8x32xbf16, #tpu.memory_space<vmem>>, vector<1x8x32xbf16>
    %98 = vector.shape_cast %97 : vector<1x8x32xbf16> to vector<8x32xbf16>
    %cst_63 = arith.constant dense<0.000000e+00> : vector<16x32xf32>
    %99 = tpu.matmul %96, %98, %cst_63 {dimension_numbers = #tpu.dot_dimension_numbers<[1], [0], [0], [1], [0, 0, 1, 1], [], []>} : vector<16x8xbf16>, vector<8x32xbf16>, vector<16x32xf32> -> vector<16x32xf32>
    %100 = arith.addf %94, %99 : vector<16x32xf32>
    %101 = arith.addf %20, %100 : vector<16x32xf32>
    %cst_64 = arith.constant dense<0.000000e+00> : vector<16xf32>
    %102 = vector.multi_reduction <add>, %101, %cst_64 [1] : vector<16x32xf32> to vector<16xf32>
    %103 = vector.shape_cast %102 : vector<16xf32> to vector<16x1xf32>
    %cst_65 = arith.constant 3.200000e+01 : f32
    %104 = vector.broadcast %cst_65 : f32 to vector<16x1xf32>
    %105 = arith.divf %103, %104 : vector<16x1xf32>
    %106 = vector.broadcast %105 : vector<16x1xf32> to vector<16x32xf32>
    %107 = arith.subf %101, %106 : vector<16x32xf32>
    %108 = arith.mulf %107, %107 : vector<16x32xf32>
    %cst_66 = arith.constant dense<0.000000e+00> : vector<16xf32>
    %109 = vector.multi_reduction <add>, %108, %cst_66 [1] : vector<16x32xf32> to vector<16xf32>
    %110 = vector.shape_cast %109 : vector<16xf32> to vector<16x1xf32>
    %cst_67 = arith.constant 3.200000e+01 : f32
    %111 = vector.broadcast %cst_67 : f32 to vector<16x1xf32>
    %112 = arith.divf %110, %111 : vector<16x1xf32>
    %cst_68 = arith.constant 9.99999974E-6 : f32
    %113 = vector.broadcast %cst_68 : f32 to vector<16x1xf32>
    %114 = arith.addf %112, %113 : vector<16x1xf32>
    %115 = math.rsqrt %114 : vector<16x1xf32>
    %116 = vector.broadcast %115 : vector<16x1xf32> to vector<16x32xf32>
    %117 = arith.mulf %107, %116 : vector<16x32xf32>
    %118 = vector.broadcast %27 : vector<1x32xf32> to vector<16x32xf32>
    %119 = arith.mulf %117, %118 : vector<16x32xf32>
    %120 = vector.broadcast %29 : vector<1x32xf32> to vector<16x32xf32>
    %121 = arith.addf %119, %120 : vector<16x32xf32>
    %122 = arith.truncf %121 : vector<16x32xf32> to vector<16x32xbf16>
    %c0_69 = arith.constant 0 : index
    %c0_70 = arith.constant 0 : index
    %c0_71 = arith.constant 0 : index
    %123 = vector.load %arg14[%c0_69, %c0_70, %c0_71] : memref<2x32x64xbf16, #tpu.memory_space<vmem>>, vector<1x32x64xbf16>
    %124 = vector.shape_cast %123 : vector<1x32x64xbf16> to vector<32x64xbf16>
    %cst_72 = arith.constant dense<0.000000e+00> : vector<16x64xf32>
    %125 = tpu.matmul %122, %124, %cst_72 {dimension_numbers = #tpu.dot_dimension_numbers<[1], [0], [0], [1], [0, 0, 1, 1], [], []>} : vector<16x32xbf16>, vector<32x64xbf16>, vector<16x64xf32> -> vector<16x64xf32>
    %126 = vector.broadcast %35 : vector<1x64xf32> to vector<16x64xf32>
    %127 = arith.addf %125, %126 : vector<16x64xf32>
    %cst_73 = arith.constant 0.000000e+00 : f32
    %128 = vector.broadcast %cst_73 : f32 to vector<16x64xf32>
    %129 = arith.maximumf %127, %128 : vector<16x64xf32>
    %130 = arith.truncf %129 : vector<16x64xf32> to vector<16x64xbf16>
    %c0_74 = arith.constant 0 : index
    %c0_75 = arith.constant 0 : index
    %c0_76 = arith.constant 0 : index
    %131 = vector.load %arg16[%c0_74, %c0_75, %c0_76] : memref<2x64x32xbf16, #tpu.memory_space<vmem>>, vector<1x64x32xbf16>
    %132 = vector.shape_cast %131 : vector<1x64x32xbf16> to vector<64x32xbf16>
    %cst_77 = arith.constant dense<0.000000e+00> : vector<16x32xf32>
    %133 = tpu.matmul %130, %132, %cst_77 {dimension_numbers = #tpu.dot_dimension_numbers<[1], [0], [0], [1], [0, 0, 1, 1], [], []>} : vector<16x64xbf16>, vector<64x32xbf16>, vector<16x32xf32> -> vector<16x32xf32>
    %134 = vector.broadcast %37 : vector<1x32xf32> to vector<16x32xf32>
    %135 = arith.addf %133, %134 : vector<16x32xf32>
    %136 = arith.addf %121, %135 : vector<16x32xf32>
    %cst_78 = arith.constant dense<0.000000e+00> : vector<16xf32>
    %137 = vector.multi_reduction <add>, %136, %cst_78 [1] : vector<16x32xf32> to vector<16xf32>
    %138 = vector.shape_cast %137 : vector<16xf32> to vector<16x1xf32>
    %cst_79 = arith.constant 3.200000e+01 : f32
    %139 = vector.broadcast %cst_79 : f32 to vector<16x1xf32>
    %140 = arith.divf %138, %139 : vector<16x1xf32>
    %141 = vector.broadcast %140 : vector<16x1xf32> to vector<16x32xf32>
    %142 = arith.subf %136, %141 : vector<16x32xf32>
    %143 = arith.mulf %142, %142 : vector<16x32xf32>
    %cst_80 = arith.constant dense<0.000000e+00> : vector<16xf32>
    %144 = vector.multi_reduction <add>, %143, %cst_80 [1] : vector<16x32xf32> to vector<16xf32>
    %145 = vector.shape_cast %144 : vector<16xf32> to vector<16x1xf32>
    %cst_81 = arith.constant 3.200000e+01 : f32
    %146 = vector.broadcast %cst_81 : f32 to vector<16x1xf32>
    %147 = arith.divf %145, %146 : vector<16x1xf32>
    %cst_82 = arith.constant 9.99999974E-6 : f32
    %148 = vector.broadcast %cst_82 : f32 to vector<16x1xf32>
    %149 = arith.addf %147, %148 : vector<16x1xf32>
    %150 = math.rsqrt %149 : vector<16x1xf32>
    %151 = vector.broadcast %150 : vector<16x1xf32> to vector<16x32xf32>
    %152 = arith.mulf %142, %151 : vector<16x32xf32>
    %153 = vector.broadcast %31 : vector<1x32xf32> to vector<16x32xf32>
    %154 = arith.mulf %152, %153 : vector<16x32xf32>
    %155 = vector.broadcast %33 : vector<1x32xf32> to vector<16x32xf32>
    %156 = arith.addf %154, %155 : vector<16x32xf32>
    %c1_83 = arith.constant 1 : index
    %c0_84 = arith.constant 0 : index
    %c0_85 = arith.constant 0 : index
    %157 = vector.load %arg9[%c1_83, %c0_84, %c0_85] : memref<2x1x96xf32, #tpu.memory_space<vmem>>, vector<1x1x96xf32>
    %158 = vector.shape_cast %157 : vector<1x1x96xf32> to vector<1x96xf32>
    %c1_86 = arith.constant 1 : index
    %c0_87 = arith.constant 0 : index
    %c0_88 = arith.constant 0 : index
    %159 = vector.load %arg11[%c1_86, %c0_87, %c0_88] : memref<2x1x32xf32, #tpu.memory_space<vmem>>, vector<1x1x32xf32>
    %160 = vector.shape_cast %159 : vector<1x1x32xf32> to vector<1x32xf32>
    %c1_89 = arith.constant 1 : index
    %c0_90 = arith.constant 0 : index
    %c0_91 = arith.constant 0 : index
    %161 = vector.load %arg12[%c1_89, %c0_90, %c0_91] : memref<2x1x32xf32, #tpu.memory_space<vmem>>, vector<1x1x32xf32>
    %162 = vector.shape_cast %161 : vector<1x1x32xf32> to vector<1x32xf32>
    %c1_92 = arith.constant 1 : index
    %c0_93 = arith.constant 0 : index
    %c0_94 = arith.constant 0 : index
    %163 = vector.load %arg13[%c1_92, %c0_93, %c0_94] : memref<2x1x32xf32, #tpu.memory_space<vmem>>, vector<1x1x32xf32>
    %164 = vector.shape_cast %163 : vector<1x1x32xf32> to vector<1x32xf32>
    %c1_95 = arith.constant 1 : index
    %c0_96 = arith.constant 0 : index
    %c0_97 = arith.constant 0 : index
    %165 = vector.load %arg18[%c1_95, %c0_96, %c0_97] : memref<2x1x32xf32, #tpu.memory_space<vmem>>, vector<1x1x32xf32>
    %166 = vector.shape_cast %165 : vector<1x1x32xf32> to vector<1x32xf32>
    %c1_98 = arith.constant 1 : index
    %c0_99 = arith.constant 0 : index
    %c0_100 = arith.constant 0 : index
    %167 = vector.load %arg19[%c1_98, %c0_99, %c0_100] : memref<2x1x32xf32, #tpu.memory_space<vmem>>, vector<1x1x32xf32>
    %168 = vector.shape_cast %167 : vector<1x1x32xf32> to vector<1x32xf32>
    %c1_101 = arith.constant 1 : index
    %c0_102 = arith.constant 0 : index
    %c0_103 = arith.constant 0 : index
    %169 = vector.load %arg15[%c1_101, %c0_102, %c0_103] : memref<2x1x64xf32, #tpu.memory_space<vmem>>, vector<1x1x64xf32>
    %170 = vector.shape_cast %169 : vector<1x1x64xf32> to vector<1x64xf32>
    %c1_104 = arith.constant 1 : index
    %c0_105 = arith.constant 0 : index
    %c0_106 = arith.constant 0 : index
    %171 = vector.load %arg17[%c1_104, %c0_105, %c0_106] : memref<2x1x32xf32, #tpu.memory_space<vmem>>, vector<1x1x32xf32>
    %172 = vector.shape_cast %171 : vector<1x1x32xf32> to vector<1x32xf32>
    %173 = arith.truncf %156 : vector<16x32xf32> to vector<16x32xbf16>
    %c1_107 = arith.constant 1 : index
    %c0_108 = arith.constant 0 : index
    %c0_109 = arith.constant 0 : index
    %174 = vector.load %arg8[%c1_107, %c0_108, %c0_109] : memref<2x32x96xbf16, #tpu.memory_space<vmem>>, vector<1x32x96xbf16>
    %175 = vector.shape_cast %174 : vector<1x32x96xbf16> to vector<32x96xbf16>
    %cst_110 = arith.constant dense<0.000000e+00> : vector<16x96xf32>
    %176 = tpu.matmul %173, %175, %cst_110 {dimension_numbers = #tpu.dot_dimension_numbers<[1], [0], [0], [1], [0, 0, 1, 1], [], []>} : vector<16x32xbf16>, vector<32x96xbf16>, vector<16x96xf32> -> vector<16x96xf32>
    %177 = vector.broadcast %158 : vector<1x96xf32> to vector<16x96xf32>
    %178 = arith.addf %176, %177 : vector<16x96xf32>
    %179 = vector.extract_strided_slice %178 {offsets = [0, 0], sizes = [16, 8], strides = [1, 1]} : vector<16x96xf32> to vector<16x8xf32>
    %180 = vector.extract_strided_slice %178 {offsets = [0, 8], sizes = [16, 8], strides = [1, 1]} : vector<16x96xf32> to vector<16x8xf32>
    %181 = vector.extract_strided_slice %178 {offsets = [0, 16], sizes = [16, 8], strides = [1, 1]} : vector<16x96xf32> to vector<16x8xf32>
    %182 = vector.extract_strided_slice %178 {offsets = [0, 24], sizes = [16, 8], strides = [1, 1]} : vector<16x96xf32> to vector<16x8xf32>
    %183 = tpu.concatenate %179, %180, %181, %182 in 0 : vector<16x8xf32>, vector<16x8xf32>, vector<16x8xf32>, vector<16x8xf32> -> vector<64x8xf32>
    %184 = vector.extract_strided_slice %178 {offsets = [0, 32], sizes = [16, 8], strides = [1, 1]} : vector<16x96xf32> to vector<16x8xf32>
    %185 = vector.extract_strided_slice %178 {offsets = [0, 40], sizes = [16, 8], strides = [1, 1]} : vector<16x96xf32> to vector<16x8xf32>
    %186 = vector.extract_strided_slice %178 {offsets = [0, 48], sizes = [16, 8], strides = [1, 1]} : vector<16x96xf32> to vector<16x8xf32>
    %187 = vector.extract_strided_slice %178 {offsets = [0, 56], sizes = [16, 8], strides = [1, 1]} : vector<16x96xf32> to vector<16x8xf32>
    %188 = tpu.concatenate %184, %185, %186, %187 in 0 : vector<16x8xf32>, vector<16x8xf32>, vector<16x8xf32>, vector<16x8xf32> -> vector<64x8xf32>
    %189 = vector.extract_strided_slice %178 {offsets = [0, 64], sizes = [16, 8], strides = [1, 1]} : vector<16x96xf32> to vector<16x8xf32>
    %190 = vector.extract_strided_slice %178 {offsets = [0, 72], sizes = [16, 8], strides = [1, 1]} : vector<16x96xf32> to vector<16x8xf32>
    %191 = vector.extract_strided_slice %178 {offsets = [0, 80], sizes = [16, 8], strides = [1, 1]} : vector<16x96xf32> to vector<16x8xf32>
    %192 = vector.extract_strided_slice %178 {offsets = [0, 88], sizes = [16, 8], strides = [1, 1]} : vector<16x96xf32> to vector<16x8xf32>
    %193 = tpu.concatenate %189, %190, %191, %192 in 0 : vector<16x8xf32>, vector<16x8xf32>, vector<16x8xf32>, vector<16x8xf32> -> vector<64x8xf32>
    %194 = arith.truncf %183 : vector<64x8xf32> to vector<64x8xbf16>
    %195 = arith.truncf %188 : vector<64x8xf32> to vector<64x8xbf16>
    %cst_111 = arith.constant dense<0.000000e+00> : vector<64x64xf32>
    %196 = tpu.matmul %194, %195, %cst_111 {dimension_numbers = #tpu.dot_dimension_numbers<[1], [1], [0], [0], [0, 0, 1, 0], [], []>} : vector<64x8xbf16>, vector<64x8xbf16>, vector<64x64xf32> -> vector<64x64xf32>
    %197 = arith.addf %196, %21 : vector<64x64xf32>
    %cst_112 = arith.constant dense<0xFF800000> : vector<64xf32>
    %198 = vector.multi_reduction <maximumf>, %197, %cst_112 [1] : vector<64x64xf32> to vector<64xf32>
    %199 = vector.shape_cast %198 : vector<64xf32> to vector<64x1xf32>
    %200 = vector.broadcast %199 : vector<64x1xf32> to vector<64x64xf32>
    %201 = arith.subf %197, %200 : vector<64x64xf32>
    %202 = math.exp %201 : vector<64x64xf32>
    %cst_113 = arith.constant dense<0.000000e+00> : vector<64xf32>
    %203 = vector.multi_reduction <add>, %202, %cst_113 [1] : vector<64x64xf32> to vector<64xf32>
    %204 = vector.shape_cast %203 : vector<64xf32> to vector<64x1xf32>
    %205 = tpu.reciprocal %204 {approx = true} : vector<64x1xf32> -> vector<64x1xf32>
    %206 = vector.broadcast %205 : vector<64x1xf32> to vector<64x64xf32>
    %207 = arith.mulf %202, %206 : vector<64x64xf32>
    %208 = arith.truncf %207 : vector<64x64xf32> to vector<64x64xbf16>
    %209 = arith.truncf %193 : vector<64x8xf32> to vector<64x8xbf16>
    %cst_114 = arith.constant dense<0.000000e+00> : vector<64x8xf32>
    %210 = tpu.matmul %208, %209, %cst_114 {dimension_numbers = #tpu.dot_dimension_numbers<[1], [0], [0], [1], [0, 0, 1, 1], [], []>} : vector<64x64xbf16>, vector<64x8xbf16>, vector<64x8xf32> -> vector<64x8xf32>
    %211 = vector.extract_strided_slice %210 {offsets = [0, 0], sizes = [16, 8], strides = [1, 1]} : vector<64x8xf32> to vector<16x8xf32>
    %212 = arith.truncf %211 : vector<16x8xf32> to vector<16x8xbf16>
    %c4 = arith.constant 4 : index
    %c0_115 = arith.constant 0 : index
    %c0_116 = arith.constant 0 : index
    %213 = vector.load %arg10[%c4, %c0_115, %c0_116] : memref<8x8x32xbf16, #tpu.memory_space<vmem>>, vector<1x8x32xbf16>
    %214 = vector.shape_cast %213 : vector<1x8x32xbf16> to vector<8x32xbf16>
    %cst_117 = arith.constant dense<0.000000e+00> : vector<16x32xf32>
    %215 = tpu.matmul %212, %214, %cst_117 {dimension_numbers = #tpu.dot_dimension_numbers<[1], [0], [0], [1], [0, 0, 1, 1], [], []>} : vector<16x8xbf16>, vector<8x32xbf16>, vector<16x32xf32> -> vector<16x32xf32>
    %216 = vector.broadcast %160 : vector<1x32xf32> to vector<16x32xf32>
    %217 = arith.addf %216, %215 : vector<16x32xf32>
    %218 = vector.extract_strided_slice %210 {offsets = [16, 0], sizes = [16, 8], strides = [1, 1]} : vector<64x8xf32> to vector<16x8xf32>
    %219 = arith.truncf %218 : vector<16x8xf32> to vector<16x8xbf16>
    %c5 = arith.constant 5 : index
    %c0_118 = arith.constant 0 : index
    %c0_119 = arith.constant 0 : index
    %220 = vector.load %arg10[%c5, %c0_118, %c0_119] : memref<8x8x32xbf16, #tpu.memory_space<vmem>>, vector<1x8x32xbf16>
    %221 = vector.shape_cast %220 : vector<1x8x32xbf16> to vector<8x32xbf16>
    %cst_120 = arith.constant dense<0.000000e+00> : vector<16x32xf32>
    %222 = tpu.matmul %219, %221, %cst_120 {dimension_numbers = #tpu.dot_dimension_numbers<[1], [0], [0], [1], [0, 0, 1, 1], [], []>} : vector<16x8xbf16>, vector<8x32xbf16>, vector<16x32xf32> -> vector<16x32xf32>
    %223 = arith.addf %217, %222 : vector<16x32xf32>
    %224 = vector.extract_strided_slice %210 {offsets = [32, 0], sizes = [16, 8], strides = [1, 1]} : vector<64x8xf32> to vector<16x8xf32>
    %225 = arith.truncf %224 : vector<16x8xf32> to vector<16x8xbf16>
    %c6 = arith.constant 6 : index
    %c0_121 = arith.constant 0 : index
    %c0_122 = arith.constant 0 : index
    %226 = vector.load %arg10[%c6, %c0_121, %c0_122] : memref<8x8x32xbf16, #tpu.memory_space<vmem>>, vector<1x8x32xbf16>
    %227 = vector.shape_cast %226 : vector<1x8x32xbf16> to vector<8x32xbf16>
    %cst_123 = arith.constant dense<0.000000e+00> : vector<16x32xf32>
    %228 = tpu.matmul %225, %227, %cst_123 {dimension_numbers = #tpu.dot_dimension_numbers<[1], [0], [0], [1], [0, 0, 1, 1], [], []>} : vector<16x8xbf16>, vector<8x32xbf16>, vector<16x32xf32> -> vector<16x32xf32>
    %229 = arith.addf %223, %228 : vector<16x32xf32>
    %230 = vector.extract_strided_slice %210 {offsets = [48, 0], sizes = [16, 8], strides = [1, 1]} : vector<64x8xf32> to vector<16x8xf32>
    %231 = arith.truncf %230 : vector<16x8xf32> to vector<16x8xbf16>
    %c7 = arith.constant 7 : index
    %c0_124 = arith.constant 0 : index
    %c0_125 = arith.constant 0 : index
    %232 = vector.load %arg10[%c7, %c0_124, %c0_125] : memref<8x8x32xbf16, #tpu.memory_space<vmem>>, vector<1x8x32xbf16>
    %233 = vector.shape_cast %232 : vector<1x8x32xbf16> to vector<8x32xbf16>
    %cst_126 = arith.constant dense<0.000000e+00> : vector<16x32xf32>
    %234 = tpu.matmul %231, %233, %cst_126 {dimension_numbers = #tpu.dot_dimension_numbers<[1], [0], [0], [1], [0, 0, 1, 1], [], []>} : vector<16x8xbf16>, vector<8x32xbf16>, vector<16x32xf32> -> vector<16x32xf32>
    %235 = arith.addf %229, %234 : vector<16x32xf32>
    %236 = arith.addf %156, %235 : vector<16x32xf32>
    %cst_127 = arith.constant dense<0.000000e+00> : vector<16xf32>
    %237 = vector.multi_reduction <add>, %236, %cst_127 [1] : vector<16x32xf32> to vector<16xf32>
    %238 = vector.shape_cast %237 : vector<16xf32> to vector<16x1xf32>
    %cst_128 = arith.constant 3.200000e+01 : f32
    %239 = vector.broadcast %cst_128 : f32 to vector<16x1xf32>
    %240 = arith.divf %238, %239 : vector<16x1xf32>
    %241 = vector.broadcast %240 : vector<16x1xf32> to vector<16x32xf32>
    %242 = arith.subf %236, %241 : vector<16x32xf32>
    %243 = arith.mulf %242, %242 : vector<16x32xf32>
    %cst_129 = arith.constant dense<0.000000e+00> : vector<16xf32>
    %244 = vector.multi_reduction <add>, %243, %cst_129 [1] : vector<16x32xf32> to vector<16xf32>
    %245 = vector.shape_cast %244 : vector<16xf32> to vector<16x1xf32>
    %cst_130 = arith.constant 3.200000e+01 : f32
    %246 = vector.broadcast %cst_130 : f32 to vector<16x1xf32>
    %247 = arith.divf %245, %246 : vector<16x1xf32>
    %cst_131 = arith.constant 9.99999974E-6 : f32
    %248 = vector.broadcast %cst_131 : f32 to vector<16x1xf32>
    %249 = arith.addf %247, %248 : vector<16x1xf32>
    %250 = math.rsqrt %249 : vector<16x1xf32>
    %251 = vector.broadcast %250 : vector<16x1xf32> to vector<16x32xf32>
    %252 = arith.mulf %242, %251 : vector<16x32xf32>
    %253 = vector.broadcast %162 : vector<1x32xf32> to vector<16x32xf32>
    %254 = arith.mulf %252, %253 : vector<16x32xf32>
    %255 = vector.broadcast %164 : vector<1x32xf32> to vector<16x32xf32>
    %256 = arith.addf %254, %255 : vector<16x32xf32>
    %257 = arith.truncf %256 : vector<16x32xf32> to vector<16x32xbf16>
    %c1_132 = arith.constant 1 : index
    %c0_133 = arith.constant 0 : index
    %c0_134 = arith.constant 0 : index
    %258 = vector.load %arg14[%c1_132, %c0_133, %c0_134] : memref<2x32x64xbf16, #tpu.memory_space<vmem>>, vector<1x32x64xbf16>
    %259 = vector.shape_cast %258 : vector<1x32x64xbf16> to vector<32x64xbf16>
    %cst_135 = arith.constant dense<0.000000e+00> : vector<16x64xf32>
    %260 = tpu.matmul %257, %259, %cst_135 {dimension_numbers = #tpu.dot_dimension_numbers<[1], [0], [0], [1], [0, 0, 1, 1], [], []>} : vector<16x32xbf16>, vector<32x64xbf16>, vector<16x64xf32> -> vector<16x64xf32>
    %261 = vector.broadcast %170 : vector<1x64xf32> to vector<16x64xf32>
    %262 = arith.addf %260, %261 : vector<16x64xf32>
    %cst_136 = arith.constant 0.000000e+00 : f32
    %263 = vector.broadcast %cst_136 : f32 to vector<16x64xf32>
    %264 = arith.maximumf %262, %263 : vector<16x64xf32>
    %265 = arith.truncf %264 : vector<16x64xf32> to vector<16x64xbf16>
    %c1_137 = arith.constant 1 : index
    %c0_138 = arith.constant 0 : index
    %c0_139 = arith.constant 0 : index
    %266 = vector.load %arg16[%c1_137, %c0_138, %c0_139] : memref<2x64x32xbf16, #tpu.memory_space<vmem>>, vector<1x64x32xbf16>
    %267 = vector.shape_cast %266 : vector<1x64x32xbf16> to vector<64x32xbf16>
    %cst_140 = arith.constant dense<0.000000e+00> : vector<16x32xf32>
    %268 = tpu.matmul %265, %267, %cst_140 {dimension_numbers = #tpu.dot_dimension_numbers<[1], [0], [0], [1], [0, 0, 1, 1], [], []>} : vector<16x64xbf16>, vector<64x32xbf16>, vector<16x32xf32> -> vector<16x32xf32>
    %269 = vector.broadcast %172 : vector<1x32xf32> to vector<16x32xf32>
    %270 = arith.addf %268, %269 : vector<16x32xf32>
    %271 = arith.addf %256, %270 : vector<16x32xf32>
    %cst_141 = arith.constant dense<0.000000e+00> : vector<16xf32>
    %272 = vector.multi_reduction <add>, %271, %cst_141 [1] : vector<16x32xf32> to vector<16xf32>
    %273 = vector.shape_cast %272 : vector<16xf32> to vector<16x1xf32>
    %cst_142 = arith.constant 3.200000e+01 : f32
    %274 = vector.broadcast %cst_142 : f32 to vector<16x1xf32>
    %275 = arith.divf %273, %274 : vector<16x1xf32>
    %276 = vector.broadcast %275 : vector<16x1xf32> to vector<16x32xf32>
    %277 = arith.subf %271, %276 : vector<16x32xf32>
    %278 = arith.mulf %277, %277 : vector<16x32xf32>
    %cst_143 = arith.constant dense<0.000000e+00> : vector<16xf32>
    %279 = vector.multi_reduction <add>, %278, %cst_143 [1] : vector<16x32xf32> to vector<16xf32>
    %280 = vector.shape_cast %279 : vector<16xf32> to vector<16x1xf32>
    %cst_144 = arith.constant 3.200000e+01 : f32
    %281 = vector.broadcast %cst_144 : f32 to vector<16x1xf32>
    %282 = arith.divf %280, %281 : vector<16x1xf32>
    %cst_145 = arith.constant 9.99999974E-6 : f32
    %283 = vector.broadcast %cst_145 : f32 to vector<16x1xf32>
    %284 = arith.addf %282, %283 : vector<16x1xf32>
    %285 = math.rsqrt %284 : vector<16x1xf32>
    %286 = vector.broadcast %285 : vector<16x1xf32> to vector<16x32xf32>
    %287 = arith.mulf %277, %286 : vector<16x32xf32>
    %288 = vector.broadcast %166 : vector<1x32xf32> to vector<16x32xf32>
    %289 = arith.mulf %287, %288 : vector<16x32xf32>
    %290 = vector.broadcast %168 : vector<1x32xf32> to vector<16x32xf32>
    %291 = arith.addf %289, %290 : vector<16x32xf32>
    %292 = arith.truncf %291 : vector<16x32xf32> to vector<16x32xbf16>
    %c0_146 = arith.constant 0 : index
    %c0_147 = arith.constant 0 : index
    %293 = vector.load %arg20[%c0_146, %c0_147] : memref<32x512xbf16, #tpu.memory_space<vmem>>, vector<32x512xbf16>
    %cst_148 = arith.constant dense<0.000000e+00> : vector<16x512xf32>
    %294 = tpu.matmul %292, %293, %cst_148 {dimension_numbers = #tpu.dot_dimension_numbers<[1], [0], [0], [1], [0, 0, 1, 1], [], []>} : vector<16x32xbf16>, vector<32x512xbf16>, vector<16x512xf32> -> vector<16x512xf32>
    %c0_149 = arith.constant 0 : index
    %c0_150 = arith.constant 0 : index
    %295 = vector.load %arg21[%c0_149, %c0_150] : memref<1x512xf32, #tpu.memory_space<vmem>>, vector<1x512xf32>
    %296 = vector.broadcast %295 : vector<1x512xf32> to vector<16x512xf32>
    %297 = arith.addf %294, %296 : vector<16x512xf32>
    %c0_151 = arith.constant 0 : index
    %c0_152 = arith.constant 0 : index
    %298 = vector.load %arg22[%c0_151, %c0_152] : memref<16x512xf32, #tpu.memory_space<vmem>>, vector<16x512xf32>
    tpu.vector_store %arg22[%c0_151, %c0_152], %297 {strides = array<i32>} : memref<16x512xf32, #tpu.memory_space<vmem>>, vector<16x512xf32>,
    return
  }
}

</mosaic_0001>

<bundles_post_ra>
// kernel: pretrain_net_forward.1
= control target key start
LH: loop header
LB: loop body
LE: loop exit
PB: predicated region body
PF: predicated region fallthrough
CT: control target
= control target key end

     0   :  { %s3864_s0 = inlined_call_operand.vmem [shape: bf16[128,1024], index: 0, kind: input, shape index: {}]   ;;  %s3865_s1 = inlined_call_operand.vmem [shape: bf16[8,128], index: 1, kind: input, shape index: {}]   ;;  %s3866_s2 = inlined_call_operand.vmem [shape: f32[8,1], index: 2, kind: input, shape index: {}]   ;;  %s3867_s3 = inlined_call_operand.vmem [shape: bf16[16,1024], index: 3, kind: input, shape index: {}]   ;;  %s3868_s4 = inlined_call_operand.vmem [shape: bf16[8,32], index: 4, kind: input, shape index: {}]   ;;  %s3869_s5 = inlined_call_operand.vmem [shape: f32[1,32], index: 5, kind: input, shape index: {}]   ;;  %s3870_s6 = inlined_call_operand.vmem [shape: f32[16,32], index: 6, kind: input, shape index: {}]   ;;  %s3871_s7 = inlined_call_operand.vmem [shape: f32[64,64], index: 7, kind: input, shape index: {}]   ;;  %s3872_s8 = inlined_call_operand.vmem [shape: bf16[2,32,96], index: 8, kind: input, shape index: {}]   ;;  %s3873_s9 = inlined_call_operand.vmem [shape: f32[2,1,96], index: 9, kind: input, shape index: {}]   ;;  %s3874_s10 = inlined_call_operand.vmem [shape: bf16[8,8,32], index: 10, kind: input, shape index: {}]   ;;  %s3875_s11 = inlined_call_operand.vmem [shape: f32[2,1,32], index: 11, kind: input, shape index: {}]   ;;  %s3876_s12 = inlined_call_operand.vmem [shape: f32[2,1,32], index: 12, kind: input, shape index: {}]   ;;  %s3877_s13 = inlined_call_operand.vmem [shape: f32[2,1,32], index: 13, kind: input, shape index: {}]   ;;  %s3878_s14 = inlined_call_operand.vmem [shape: bf16[2,32,64], index: 14, kind: input, shape index: {}]   ;;  %s3879_s15 = inlined_call_operand.vmem [shape: f32[2,1,64], index: 15, kind: input, shape index: {}]   ;;  %s3880_s16 = inlined_call_operand.vmem [shape: bf16[2,64,32], index: 16, kind: input, shape index: {}]   ;;  %s3881_s17 = inlined_call_operand.vmem [shape: f32[2,1,32], index: 17, kind: input, shape index: {}]   ;;  %s3882_s18 = inlined_call_operand.vmem [shape: f32[2,1,32], index: 18, kind: input, shape index: {}]   ;;  %s3883_s19 = inlined_call_operand.vmem [shape: f32[2,1,32], index: 19, kind: input, shape index: {}]   ;;  %s3884_s20 = inlined_call_operand.vmem [shape: bf16[32,512], index: 20, kind: input, shape index: {}]   ;;  %s3885_s21 = inlined_call_operand.vmem [shape: f32[1,512], index: 21, kind: input, shape index: {}]   ;;  %s3886_s22 = inlined_call_operand.hbm [shape: f32[16,512], index: 22, kind: output, shape index: {}]  }
   0x1   :  { %3890 = sst [smem:[#allocation5_spill]] %s3864_s0 }
   0x2   :  { %3891 = sst [smem:[#allocation6_spill]] %s3865_s1 }
   0x3   :  { %3892 = sst [smem:[#allocation7_spill]] %s3866_s2 }
   0x4   :  { %3893 = sst [smem:[#allocation8_spill]] %s3867_s3 }
   0x5   :  { %3894 = sst [smem:[#allocation9_spill]] %s3868_s4 }
   0x6   :  { %3895 = sst [smem:[#allocation10_spill]] %s3869_s5 }
   0x7   :  { %3896 = sst [smem:[#allocation11_spill]] %s3870_s6 }
   0x8   :  { %s3897_s29 = sld [smem:[#allocation5_spill]] }
   0x9   :  { %s3898_s24 = sld [smem:[#allocation6_spill]] }
   0xa   :  { %s3899_s27 = sld [smem:[#allocation7_spill]] }
   0xe   :  { %v2347_v0 = vld [vmem:[%s3897_s29 + $0x1c0] sm:$0xf]  ;;  %v2627_v2 = vld [vmem:[%s3897_s29 + $0x1c4] sm:$0xf]  ;;  %v2355_v5 = vld [vmem:[%s3897_s29 + $0x1c8] sm:$0xf] }
   0xf   :  { %v2631_v1 = vld [vmem:[%s3897_s29 + $0x1dc] sm:$0xf0]  ;;  %v2349_v4 = vld [vmem:[%s3897_s29 + $0x1e0] sm:$0xf0]  ;;  %v2632_v6 = vld [vmem:[%s3897_s29 + $0x1e4] sm:$0xf0] }
  0x10   :  { %v2348_v3 = vor.u32 %v2631_v1, %v2347_v0  ;;  %v2352_v7 = vor.u32 %v2627_v2, %v2349_v4  ;;  %v2356_v8 = vor.u32 %v2632_v6, %v2355_v5  ;;  %v2628_v9 = vld [vmem:[%s3897_s29 + $0x1cc] sm:$0xf]  ;;  %v2315_v11 = vld [vmem:[%s3897_s29 + $0x180] sm:$0xf]  ;;  %v2619_v14 = vld [vmem:[%s3897_s29 + $0x184] sm:$0xf] }
  0x11   :  { %v2357_v10 = vld [vmem:[%s3897_s29 + $0x1e8] sm:$0xf0]  ;;  %v2623_v13 = vld [vmem:[%s3897_s29 + $0x19c] sm:$0xf0]  ;;  %v2317_v15 = vld [vmem:[%s3897_s29 + $0x1a0] sm:$0xf0] }
  0x12   :  { %464 = vmatpush.bf16.msra.mxu0 %v2348_v3  ;;  %v2360_v12 = vor.u32 %v2628_v9, %v2357_v10  ;;  %477 = vmatpush.bf16.msra.mxu1 %v2352_v7  ;;  %v2316_v16 = vor.u32 %v2623_v13, %v2315_v11  ;;  %v2320_v17 = vor.u32 %v2619_v14, %v2317_v15  ;;  %v2323_v18 = vld [vmem:[%s3897_s29 + $0x188] sm:$0xf]  ;;  %v2620_v20 = vld [vmem:[%s3897_s29 + $0x18c] sm:$0xf]  ;;  %v2283_v23 = vld [vmem:[%s3897_s29 + $0x140] sm:$0xf] }
  0x13   :  { %490 = vmatpush.bf16.msra.mxu2 %v2356_v8  ;;  %v2624_v19 = vld [vmem:[%s3897_s29 + $0x1a4] sm:$0xf0]  ;;  %v2325_v22 = vld [vmem:[%s3897_s29 + $0x1a8] sm:$0xf0]  ;;  %v2615_v24 = vld [vmem:[%s3897_s29 + $0x15c] sm:$0xf0] }
  0x14   :  { %503 = vmatpush.bf16.msra.mxu3 %v2360_v12  ;;  %v2324_v21 = vor.u32 %v2624_v19, %v2323_v18  ;;  %v2328_v25 = vor.u32 %v2620_v20, %v2325_v22  ;;  %v2611_v26 = vld [vmem:[%s3897_s29 + $0x144] sm:$0xf]  ;;  %v2291_v28 = vld [vmem:[%s3897_s29 + $0x148] sm:$0xf]  ;;  %v2284_v29 = vor.u32 %v2615_v24, %v2283_v23  ;;  %v2612_v31 = vld [vmem:[%s3897_s29 + $0x14c] sm:$0xf] }
  0x15   :  { %v2285_v27 = vld [vmem:[%s3897_s29 + $0x160] sm:$0xf0]  ;;  %v2616_v30 = vld [vmem:[%s3897_s29 + $0x164] sm:$0xf0]  ;;  %v2293_v32 = vld [vmem:[%s3897_s29 + $0x168] sm:$0xf0] }
  0x16   :  { %465 = vmatpush.bf16.msra.mxu0 %v2316_v16  ;;  %478 = vmatpush.bf16.msra.mxu1 %v2320_v17  ;;  %v2288_v33 = vor.u32 %v2611_v26, %v2285_v27  ;;  %v2292_v34 = vor.u32 %v2616_v30, %v2291_v28  ;;  %v2251_v35 = vld [vmem:[%s3897_s29 + $0x100] sm:$0xf]  ;;  %v2603_v37 = vld [vmem:[%s3897_s29 + $0x104] sm:$0xf]  ;;  %v2296_v38 = vor.u32 %v2612_v31, %v2293_v32  ;;  %v2259_v40 = vld [vmem:[%s3897_s29 + $0x108] sm:$0xf] }
  0x17   :  { %491 = vmatpush.bf16.msra.mxu2 %v2324_v21  ;;  %v2607_v36 = vld [vmem:[%s3897_s29 + $0x11c] sm:$0xf0]  ;;  %v2253_v39 = vld [vmem:[%s3897_s29 + $0x120] sm:$0xf0]  ;;  %v2608_v41 = vld [vmem:[%s3897_s29 + $0x124] sm:$0xf0] }
  0x18   :  { %504 = vmatpush.bf16.msra.mxu3 %v2328_v25  ;;  %v2604_v42 = vld [vmem:[%s3897_s29 + $0x10c] sm:$0xf]  ;;  %v2252_v44 = vor.u32 %v2607_v36, %v2251_v35  ;;  %v2256_v45 = vor.u32 %v2603_v37, %v2253_v39  ;;  %v2260_v46 = vor.u32 %v2608_v41, %v2259_v40  ;;  %v2219_v47 = vld [vmem:[%s3897_s29 + $0xc0] sm:$0xf]  ;;  %v2595_v49 = vld [vmem:[%s3897_s29 + $0xc4] sm:$0xf] }
  0x19   :  { %v2261_v43 = vld [vmem:[%s3897_s29 + $0x128] sm:$0xf0]  ;;  %v2599_v48 = vld [vmem:[%s3897_s29 + $0xdc] sm:$0xf0]  ;;  %v2221_v51 = vld [vmem:[%s3897_s29 + $0xe0] sm:$0xf0] }
  0x1a   :  { %466 = vmatpush.bf16.msra.mxu0 %v2284_v29  ;;  %479 = vmatpush.bf16.msra.mxu1 %v2288_v33  ;;  %v2264_v50 = vor.u32 %v2604_v42, %v2261_v43  ;;  %v2227_v52 = vld [vmem:[%s3897_s29 + $0xc8] sm:$0xf]  ;;  %v2596_v54 = vld [vmem:[%s3897_s29 + $0xcc] sm:$0xf]  ;;  %v2220_v56 = vor.u32 %v2599_v48, %v2219_v47  ;;  %v2224_v57 = vor.u32 %v2595_v49, %v2221_v51  ;;  %v2187_v59 = vld [vmem:[%s3897_s29 + $0x80] sm:$0xf] }
  0x1b   :  { %492 = vmatpush.bf16.msra.mxu2 %v2292_v34  ;;  %v2600_v53 = vld [vmem:[%s3897_s29 + $0xe4] sm:$0xf0]  ;;  %v2229_v55 = vld [vmem:[%s3897_s29 + $0xe8] sm:$0xf0]  ;;  %v2591_v60 = vld [vmem:[%s3897_s29 + $0x9c] sm:$0xf0] }
  0x1c   :  { %505 = vmatpush.bf16.msra.mxu3 %v2296_v38  ;;  %v2228_v58 = vor.u32 %v2600_v53, %v2227_v52  ;;  %v2587_v61 = vld [vmem:[%s3897_s29 + $0x84] sm:$0xf]  ;;  %v2232_v62 = vor.u32 %v2596_v54, %v2229_v55  ;;  %v2195_v0 = vld [vmem:[%s3897_s29 + $0x88] sm:$0xf]  ;;  %v2588_v2 = vld [vmem:[%s3897_s29 + $0x8c] sm:$0xf]  ;;  %v2188_v4 = vor.u32 %v2591_v60, %v2187_v59 }
  0x1d   :  { %v2189_v63 = vld [vmem:[%s3897_s29 + $0xa0] sm:$0xf0]  ;;  %v2592_v1 = vld [vmem:[%s3897_s29 + $0xa4] sm:$0xf0]  ;;  %v2197_v3 = vld [vmem:[%s3897_s29 + $0xa8] sm:$0xf0] }
  0x1e   :  { %467 = vmatpush.bf16.msra.mxu0 %v2252_v44  ;;  %480 = vmatpush.bf16.msra.mxu1 %v2256_v45  ;;  %v2192_v5 = vor.u32 %v2587_v61, %v2189_v63  ;;  %v2196_v6 = vor.u32 %v2592_v1, %v2195_v0  ;;  %v2155_v7 = vld [vmem:[%s3897_s29 + $0x40] sm:$0xf]  ;;  %v2579_v9 = vld [vmem:[%s3897_s29 + $0x44] sm:$0xf]  ;;  %v2200_v10 = vor.u32 %v2588_v2, %v2197_v3  ;;  %v2163_v12 = vld [vmem:[%s3897_s29 + $0x48] sm:$0xf] }
  0x1f   :  { %493 = vmatpush.bf16.msra.mxu2 %v2260_v46  ;;  %v2583_v8 = vld [vmem:[%s3897_s29 + $0x5c] sm:$0xf0]  ;;  %v2157_v11 = vld [vmem:[%s3897_s29 + $0x60] sm:$0xf0]  ;;  %v2584_v13 = vld [vmem:[%s3897_s29 + $0x64] sm:$0xf0] }
  0x20   :  { %506 = vmatpush.bf16.msra.mxu3 %v2264_v50  ;;  %v2580_v14 = vld [vmem:[%s3897_s29 + $0x4c] sm:$0xf]  ;;  %v2156_v16 = vor.u32 %v2583_v8, %v2155_v7  ;;  %v2123_v17 = vld [vmem:[%s3897_s29] sm:$0xf]  ;;  %v2160_v19 = vor.u32 %v2579_v9, %v2157_v11  ;;  %v2164_v20 = vor.u32 %v2584_v13, %v2163_v12  ;;  %v2571_v21 = vld [vmem:[%s3897_s29 + $0x4] sm:$0xf] }
  0x21   :  { %v2165_v15 = vld [vmem:[%s3897_s29 + $0x68] sm:$0xf0]  ;;  %v2575_v18 = vld [vmem:[%s3897_s29 + $0x1c] sm:$0xf0]  ;;  %v2125_v22 = vld [vmem:[%s3897_s29 + $0x20] sm:$0xf0] }
  0x22   :  { %468 = vmatpush.bf16.msra.mxu0 %v2220_v56  ;;  %481 = vmatpush.bf16.msra.mxu1 %v2224_v57  ;;  %v2131_v23 = vld [vmem:[%s3897_s29 + $0x8] sm:$0xf]  ;;  %v2168_v24 = vor.u32 %v2580_v14, %v2165_v15  ;;  %v2572_v26 = vld [vmem:[%s3897_s29 + $0xc] sm:$0xf]  ;;  %v2363_v28 = vld [vmem:[%s3897_s29 + $0x1d0] sm:$0xf]  ;;  %v2124_v31 = vor.u32 %v2575_v18, %v2123_v17  ;;  %v2128_v35 = vor.u32 %v2571_v21, %v2125_v22 }
  0x23   :  { %494 = vmatpush.bf16.msra.mxu2 %v2228_v58  ;;  %v2576_v25 = vld [vmem:[%s3897_s29 + $0x24] sm:$0xf0]  ;;  %v2133_v27 = vld [vmem:[%s3897_s29 + $0x28] sm:$0xf0]  ;;  %v2633_v29 = vld [vmem:[%s3897_s29 + $0x1ec] sm:$0xf0] }
  0x24   :  { %507 = vmatpush.bf16.msra.mxu3 %v2232_v62  ;;  %v2629_v30 = vld [vmem:[%s3897_s29 + $0x1d4] sm:$0xf]  ;;  %v2371_v33 = vld [vmem:[%s3897_s29 + $0x1d8] sm:$0xf]  ;;  %v2132_v36 = vor.u32 %v2576_v25, %v2131_v23  ;;  %v2630_v37 = vld [vmem:[%s3897_s29 + $0x1dc] sm:$0xf]  ;;  %v2136_v39 = vor.u32 %v2572_v26, %v2133_v27  ;;  %v2364_v40 = vor.u32 %v2633_v29, %v2363_v28 }
  0x25   :  { %v2365_v32 = vld [vmem:[%s3897_s29 + $0x1f0] sm:$0xf0]  ;;  %v2634_v34 = vld [vmem:[%s3897_s29 + $0x1f4] sm:$0xf0]  ;;  %v2373_v38 = vld [vmem:[%s3897_s29 + $0x1f8] sm:$0xf0] }
  0x26   :  { %469 = vmatpush.bf16.msra.mxu0 %v2188_v4  ;;  %482 = vmatpush.bf16.msra.mxu1 %v2192_v5  ;;  %v2368_v41 = vor.u32 %v2629_v30, %v2365_v32  ;;  %v2372_v42 = vor.u32 %v2634_v34, %v2371_v33  ;;  %v2331_v43 = vld [vmem:[%s3897_s29 + $0x190] sm:$0xf]  ;;  %v2621_v45 = vld [vmem:[%s3897_s29 + $0x194] sm:$0xf]  ;;  %v2376_v46 = vor.u32 %v2630_v37, %v2373_v38  ;;  %v2339_v48 = vld [vmem:[%s3897_s29 + $0x198] sm:$0xf] }
  0x27   :  { %495 = vmatpush.bf16.msra.mxu2 %v2196_v6  ;;  %v2625_v44 = vld [vmem:[%s3897_s29 + $0x1ac] sm:$0xf0]  ;;  %v2333_v47 = vld [vmem:[%s3897_s29 + $0x1b0] sm:$0xf0]  ;;  %v2626_v49 = vld [vmem:[%s3897_s29 + $0x1b4] sm:$0xf0] }
  0x28   :  { %508 = vmatpush.bf16.msra.mxu3 %v2200_v10  ;;  %v2622_v50 = vld [vmem:[%s3897_s29 + $0x19c] sm:$0xf]  ;;  %v3201_v52 = vld [vmem:[%s3898_s24] sm:$0xf]  ;;  %v2332_v53 = vor.u32 %v2625_v44, %v2331_v43  ;;  %v2336_v54 = vor.u32 %v2621_v45, %v2333_v47  ;;  %v2340_v55 = vor.u32 %v2626_v49, %v2339_v48  ;;  %v2299_v56 = vld [vmem:[%s3897_s29 + $0x150] sm:$0xf] }
  0x29   :  { %v2341_v51 = vld [vmem:[%s3897_s29 + $0x1b8] sm:$0xf0]  ;;  %v2617_v57 = vld [vmem:[%s3897_s29 + $0x16c] sm:$0xf0]  ;;  %v2613_v58 = vld [vmem:[%s3897_s29 + $0x154] sm:$0xf] }
  0x2a   :  { %470 = vmatpush.bf16.msra.mxu0 %v2156_v16  ;;  %483 = vmatpush.bf16.msra.mxu1 %v2160_v19  ;;  %v2344_v59 = vor.u32 %v2622_v50, %v2341_v51  ;;  %v2301_v60 = vld [vmem:[%s3897_s29 + $0x170] sm:$0xf0]  ;;  %v2307_v61 = vld [vmem:[%s3897_s29 + $0x158] sm:$0xf]  ;;  %v2614_v63 = vld [vmem:[%s3897_s29 + $0x15c] sm:$0xf]  ;;  %v2300_v1 = vor.u32 %v2617_v57, %v2299_v56 }
  0x2b   :  { %496 = vmatpush.bf16.msra.mxu2 %v2164_v20  ;;  %v2618_v62 = vld [vmem:[%s3897_s29 + $0x174] sm:$0xf0]  ;;  %v2309_v0 = vld [vmem:[%s3897_s29 + $0x178] sm:$0xf0]  ;;  %v138_v2 = vld [vmem:[%s3899_s27] sm:$0xff]  ;;  %v2304_v3 = vor.u32 %v2613_v58, %v2301_v60  ;;  %v2833_v12 = vmov 0  }
  0x2c   :  { %509 = vmatpush.bf16.msra.mxu3 %v2168_v24  ;;  %v2308_v4 = vor.u32 %v2618_v62, %v2307_v61  ;;  %v2267_v5 = vld [vmem:[%s3897_s29 + $0x110] sm:$0xf]  ;;  %v2605_v7 = vld [vmem:[%s3897_s29 + $0x114] sm:$0xf]  ;;  %v2312_v8 = vor.u32 %v2614_v63, %v2309_v0  ;;  %v2275_v10 = vld [vmem:[%s3897_s29 + $0x118] sm:$0xf]  ;;  %2677 = vset.pattern.permute.xlu0 %v2833_v12 }
  0x2d   :  { %v2609_v6 = vld [vmem:[%s3897_s29 + $0x12c] sm:$0xf0]  ;;  %v2269_v9 = vld [vmem:[%s3897_s29 + $0x130] sm:$0xf0]  ;;  %v2610_v11 = vld [vmem:[%s3897_s29 + $0x134] sm:$0xf0]  ;;  %141 = vperm.xlu0 %2677, %v138_v2  }
  0x2e   :  { %471 = vmatpush.bf16.msra.mxu0 %v2124_v31  ;;  %484 = vmatpush.bf16.msra.mxu1 %v2128_v35  ;;  %v2606_v13 = vld [vmem:[%s3897_s29 + $0x11c] sm:$0xf]  ;;  %v2235_v15 = vld [vmem:[%s3897_s29 + $0xd0] sm:$0xf]  ;;  %v2268_v16 = vor.u32 %v2609_v6, %v2267_v5  ;;  %v2597_v18 = vld [vmem:[%s3897_s29 + $0xd4] sm:$0xf]  ;;  %v2272_v20 = vor.u32 %v2605_v7, %v2269_v9  ;;  %v2276_v21 = vor.u32 %v2610_v11, %v2275_v10 }
  0x2f   :  { %497 = vmatpush.bf16.msra.mxu2 %v2132_v36  ;;  %v2277_v14 = vld [vmem:[%s3897_s29 + $0x138] sm:$0xf0]  ;;  %v2601_v17 = vld [vmem:[%s3897_s29 + $0xec] sm:$0xf0]  ;;  %v2237_v19 = vld [vmem:[%s3897_s29 + $0xf0] sm:$0xf0] }
  0x30   :  { %510 = vmatpush.bf16.msra.mxu3 %v2136_v39  ;;  %v2243_v22 = vld [vmem:[%s3897_s29 + $0xd8] sm:$0xf]  ;;  %v2598_v24 = vld [vmem:[%s3897_s29 + $0xdc] sm:$0xf]  ;;  %v2280_v25 = vor.u32 %v2606_v13, %v2277_v14  ;;  %v2203_v27 = vld [vmem:[%s3897_s29 + $0x90] sm:$0xf]  ;;  %v2236_v29 = vor.u32 %v2601_v17, %v2235_v15  ;;  %v2240_v34 = vor.u32 %v2597_v18, %v2237_v19 }
  0x31   :  { %472 = vmatmul.bf16.vlgmr.msra.gmra.mxu0 %v3201_v52  ;;  %485 = vmatmul.bf16.vlgmr.msra.gmra.mxu1 %v3201_v52  ;;  %v2602_v23 = vld [vmem:[%s3897_s29 + $0xf4] sm:$0xf0]  ;;  %v2245_v26 = vld [vmem:[%s3897_s29 + $0xf8] sm:$0xf0]  ;;  %v2593_v28 = vld [vmem:[%s3897_s29 + $0xac] sm:$0xf0] }
  0x32   :  { %516 = vmatpush.bf16.msrb.mxu0 %v2364_v40  ;;  %529 = vmatpush.bf16.msrb.mxu1 %v2368_v41  ;;  %v2589_v30 = vld [vmem:[%s3897_s29 + $0x94] sm:$0xf]  ;;  %v2211_v32 = vld [vmem:[%s3897_s29 + $0x98] sm:$0xf]  ;;  %v2244_v35 = vor.u32 %v2602_v23, %v2243_v22  ;;  %v2590_v36 = vld [vmem:[%s3897_s29 + $0x9c] sm:$0xf]  ;;  %v2248_v38 = vor.u32 %v2598_v24, %v2245_v26  ;;  %v2204_v39 = vor.u32 %v2593_v28, %v2203_v27 }
  0x33   :  { %542 = vmatpush.bf16.msrb.mxu2 %v2372_v42  ;;  %511 = vmatmul.bf16.vlgmr.msra.gmra.mxu3 %v3201_v52  ;;  %v2205_v31 = vld [vmem:[%s3897_s29 + $0xb0] sm:$0xf0]  ;;  %v2594_v33 = vld [vmem:[%s3897_s29 + $0xb4] sm:$0xf0]  ;;  %v2213_v37 = vld [vmem:[%s3897_s29 + $0xb8] sm:$0xf0] }
  0x34   :  { %555 = vmatpush.bf16.msrb.mxu3 %v2376_v46  ;;  %498 = vmatmul.bf16.vlgmr.msra.gmra.mxu2 %v3201_v52 }
  0x36   :  { %517 = vmatpush.bf16.msrb.mxu0 %v2332_v53  ;;  %530 = vmatpush.bf16.msrb.mxu1 %v2336_v54 }
  0x37   :  { %543 = vmatpush.bf16.msrb.mxu2 %v2340_v55 }
  0x38   :  { %556 = vmatpush.bf16.msrb.mxu3 %v2344_v59 }
  0x3a   :  { %518 = vmatpush.bf16.msrb.mxu0 %v2300_v1  ;;  %531 = vmatpush.bf16.msrb.mxu1 %v2304_v3 }
  0x3b   :  { %544 = vmatpush.bf16.msrb.mxu2 %v2308_v4 }
  0x3c   :  { %557 = vmatpush.bf16.msrb.mxu3 %v2312_v8 }
  0x3e   :  { %519 = vmatpush.bf16.msrb.mxu0 %v2268_v16  ;;  %532 = vmatpush.bf16.msrb.mxu1 %v2272_v20 }
  0x3f   :  { %545 = vmatpush.bf16.msrb.mxu2 %v2276_v21 }
  0x40   :  { %558 = vmatpush.bf16.msrb.mxu3 %v2280_v25 }
  0x42   :  { %520 = vmatpush.bf16.msrb.mxu0 %v2236_v29 }
  0x43   :  { %27 = vsyncpa [#allocation3], 0  ;;  %533 = vmatpush.bf16.msrb.mxu1 %v2240_v34  ;;  %546 = vmatpush.bf16.msrb.mxu2 %v2244_v35  ;;  %v2208_v40 = vor.u32 %v2589_v30, %v2205_v31  ;;  %v2212_v41 = vor.u32 %v2594_v33, %v2211_v32  ;;  %v2171_v42 = vld [vmem:[%s3897_s29 + $0x50] sm:$0xf]  ;;  %v2581_v44 = vld [vmem:[%s3897_s29 + $0x54] sm:$0xf]  ;;  %v2216_v45 = vor.u32 %v2590_v36, %v2213_v37 }
  0x44   :  { %v2585_v43 = vld [vmem:[%s3897_s29 + $0x6c] sm:$0xf0]  ;;  %559 = vmatpush.bf16.msrb.mxu3 %v2248_v38  ;;  %v2173_v46 = vld [vmem:[%s3897_s29 + $0x70] sm:$0xf0]  ;;  %v2179_v47 = vld [vmem:[%s3897_s29 + $0x58] sm:$0xf] }
  0x45   :  { %v2586_v48 = vld [vmem:[%s3897_s29 + $0x74] sm:$0xf0]  ;;  %v2582_v49 = vld [vmem:[%s3897_s29 + $0x5c] sm:$0xf]  ;;  %v2172_v51 = vor.u32 %v2585_v43, %v2171_v42  ;;  %v2176_v53 = vor.u32 %v2581_v44, %v2173_v46  ;;  %v2139_v55 = vld [vmem:[%s3897_s29 + $0x10] sm:$0xf] }
  0x46   :  { %v2181_v50 = vld [vmem:[%s3897_s29 + $0x78] sm:$0xf0]  ;;  %521 = vmatpush.bf16.msrb.mxu0 %v2204_v39  ;;  %v2180_v54 = vor.u32 %v2586_v48, %v2179_v47  ;;  %v2577_v56 = vld [vmem:[%s3897_s29 + $0x2c] sm:$0xf0]  ;;  %v2573_v57 = vld [vmem:[%s3897_s29 + $0x14] sm:$0xf] }
  0x47   :  { %534 = vmatpush.bf16.msrb.mxu1 %v2208_v40  ;;  %547 = vmatpush.bf16.msrb.mxu2 %v2212_v41  ;;  %v2184_v58 = vor.u32 %v2582_v49, %v2181_v50  ;;  %v2141_v59 = vld [vmem:[%s3897_s29 + $0x30] sm:$0xf0]  ;;  %v2147_v60 = vld [vmem:[%s3897_s29 + $0x18] sm:$0xf]  ;;  %v2574_v62 = vld [vmem:[%s3897_s29 + $0x1c] sm:$0xf]  ;;  %v2140_v0 = vor.u32 %v2577_v56, %v2139_v55 }
  0x48   :  { %560 = vmatpush.bf16.msrb.mxu3 %v2216_v45  ;;  %v2578_v61 = vld [vmem:[%s3897_s29 + $0x34] sm:$0xf0]  ;;  %v2149_v63 = vld [vmem:[%s3897_s29 + $0x38] sm:$0xf0]  ;;  %v2144_v1 = vor.u32 %v2573_v57, %v2141_v59  ;;  %s3900_s26 = sld [smem:[#allocation8_spill]]  ;;  %vm754_vm0 = vcmask 1043456  }
  0x49   :  { %v2148_v2 = vor.u32 %v2578_v61, %v2147_v60  ;;  %v2152_v3 = vor.u32 %v2574_v62, %v2149_v63  ;;  %s3901_s30 = sld [smem:[#allocation9_spill]]  ;;  %vm750_vm1 = vcmask 64512   ;;  %vm814_vm2 = vcmask 261120   ;;  %s2836_s4 = smov 120  }
  0x4a   :  { %522 = vmatpush.bf16.msrb.mxu0 %v2172_v51  ;;  %s3902_s24 = sld [smem:[#allocation10_spill]]  ;;  %s2837_s0 = smov 96   ;;  %vm921_vm3 = vcmask 523264  }
  0x4b   :  { %535 = vmatpush.bf16.msrb.mxu1 %v2176_v53  ;;  %548 = vmatpush.bf16.msrb.mxu2 %v2180_v54  ;;  %s3903_s25 = sld [smem:[#allocation11_spill]]  ;;  %s2838_s23 = smov 64  }
  0x4c   :  { %561 = vmatpush.bf16.msrb.mxu3 %v2184_v58  ;;  %s2109_s2 = sshll.u32 %s3886_s22, 4  ;;  %s2841_s27 = smov 512   ;;  %s2110_s2 = int_to_ptr.hbm [resolvable:$true] %s2109_s2 }
  0x4d   :  { %s2842_s3 = smov 32  }
  0x4e   :  { %523 = vmatpush.bf16.msrb.mxu0 %v2140_v0  ;;  %v2379_v17 = vld [vmem:[%s3900_s26] sm:$0xf]  ;;  %v2635_v20 = vld [vmem:[%s3900_s26 + $0x4] sm:$0xf]  ;;  %v2387_v28 = vld [vmem:[%s3900_s26 + $0x8] sm:$0xf] }
  0x4f   :  { %536 = vmatpush.bf16.msrb.mxu1 %v2144_v1  ;;  %549 = vmatpush.bf16.msrb.mxu2 %v2148_v2  ;;  %v2381_v21 = vld [vmem:[%s3900_s26 + $0x20] sm:$0xf0]  ;;  %v2640_v29 = vld [vmem:[%s3900_s26 + $0x24] sm:$0xf0]  ;;  %v2636_v31 = vld [vmem:[%s3900_s26 + $0xc] sm:$0xf] }
  0x50   :  { %562 = vmatpush.bf16.msrb.mxu3 %v2152_v3  ;;  %v2384_v27 = vor.u32 %v2635_v20, %v2381_v21  ;;  %v2389_v32 = vld [vmem:[%s3900_s26 + $0x28] sm:$0xf0]  ;;  %v2388_v34 = vor.u32 %v2640_v29, %v2387_v28  ;;  %v2395_v45 = vld [vmem:[%s3900_s26 + $0x10] sm:$0xf]  ;;  %v2637_v50 = vld [vmem:[%s3900_s26 + $0x14] sm:$0xf] }
  0x51   :  { %524 = vmatmul.bf16.vlgmr.msrb.gmra.mxu0 %v3201_v52  ;;  %v2392_v35 = vor.u32 %v2636_v31, %v2389_v32  ;;  %v2641_v46 = vld [vmem:[%s3900_s26 + $0x2c] sm:$0xf0]  ;;  %v2397_v51 = vld [vmem:[%s3900_s26 + $0x30] sm:$0xf0]  ;;  %v2403_v61 = vld [vmem:[%s3900_s26 + $0x18] sm:$0xf] }
  0x52   :  { %537 = vmatmul.bf16.vlgmr.msrb.gmra.mxu1 %v3201_v52  ;;  %550 = vmatmul.bf16.vlgmr.msrb.gmra.mxu2 %v3201_v52  ;;  %v2396_v56 = vor.u32 %v2641_v46, %v2395_v45  ;;  %v2400_v58 = vor.u32 %v2637_v50, %v2397_v51  ;;  %v2642_v62 = vld [vmem:[%s3900_s26 + $0x34] sm:$0xf0]  ;;  %v2638_v0 = vld [vmem:[%s3900_s26 + $0x1c] sm:$0xf]  ;;  %v774_v45 = vld [vmem:[%s3903_s25] sm:$0xff] }
  0x53   :  { %563 = vmatmul.bf16.vlgmr.msrb.gmra.mxu3 %v3201_v52  ;;  %v2639_v52 = vld [vmem:[%s3900_s26 + $0x1c] sm:$0xf0]  ;;  %v2405_v1 = vld [vmem:[%s3900_s26 + $0x38] sm:$0xf0]  ;;  %v2404_v3 = vor.u32 %v2642_v62, %v2403_v61  ;;  %v775_v46 = vld [vmem:[%s3903_s25 + $0x8] sm:$0xff]  ;;  %s2835_s26 = smov 104  }
  0x54   :  { %v2380_v25 = vor.u32 %v2639_v52, %v2379_v17 }
  0x9f   :  { %v142_v4 = vpop.permute.xlu0 %141 }
  0xae   :  { %v473_v5 = vpop.f32.mrf.mxu0  ;;  %v486_v7 = vpop.f32.mrf.mxu1 }
  0xaf   :  { %v474_v6 = vadd.f32 %v473_v5, %v142_v4  ;;  %v487_v8 = vadd.f32 %v486_v7, %v142_v4  ;;  %v745_v7 = vld [vmem:[%s3901_s30] sm:$0xf]  ;;  %s2834_s30 = smov 112  }
  0xb1   :  { %v568_v9 = vmax.f32 %v474_v6, 0.0  ;;  %v569_v10 = vmax.f32 %v487_v8, 0.0 }
  0xb3   :  { %v584_v12 = vpack.c.bf16 %v568_v9, %v568_v9  ;;  %v585_v15 = vpack.c.bf16 %v569_v10, %v569_v10  ;;  %v756_v9 = vsel %vm754_vm0, %v745_v7, 0 }
  0xb5   :  { %639 = vmatpush.bf16.xpose.msra.mxu0 %v584_v12  ;;  %653 = vmatpush.bf16.xpose.msra.mxu1 %v585_v15 }
  0xb6   :  { %v512_v14 = vpop.f32.mrf.mxu3  ;;  %v475_v19 = vpop.f32.mrf.mxu0 }
  0xb7   :  { %v499_v11 = vpop.f32.mrf.mxu2  ;;  %v513_v16 = vadd.f32 %v512_v14, %v142_v4  ;;  %v488_v23 = vpop.f32.mrf.mxu1 }
  0xb8   :  { %v500_v13 = vadd.f32 %v499_v11, %v142_v4 }
  0xb9   :  { %v571_v22 = vmax.f32 %v513_v16, 0.0 }
  0xba   :  { %v570_v18 = vmax.f32 %v500_v13, 0.0 }
  0xbb   :  { %v587_v26 = vpack.c.bf16 %v571_v22, %v571_v22 }
  0xbc   :  { %v586_v24 = vpack.c.bf16 %v570_v18, %v570_v18  ;;  %640 = vmatmul.bf16.vlgmr.msra.gmra.mxu0 %v2380_v25  ;;  %654 = vmatmul.bf16.vlgmr.msra.gmra.mxu1 %v2384_v27 }
  0xbd   :  { %681 = vmatpush.bf16.xpose.msra.mxu3 %v587_v26 }
  0xbe   :  { %667 = vmatpush.bf16.xpose.msra.mxu2 %v586_v24  ;;  %v514_v33 = vpop.f32.mrf.mxu3 }
  0xbf   :  { %v501_v30 = vpop.f32.mrf.mxu2 }
  0xc4   :  { %682 = vmatmul.bf16.vlgmr.msra.gmra.mxu3 %v2392_v35 }
  0xc5   :  { %668 = vmatmul.bf16.vlgmr.msra.gmra.mxu2 %v2388_v34 }
  0xce   :  { %v525_v36 = vpop.f32.mrf.mxu0 }
  0xcf   :  { %v526_v37 = vadd.f32 %v525_v36, %v142_v4  ;;  %v538_v38 = vpop.f32.mrf.mxu1 }
  0xd0   :  { %v539_v39 = vadd.f32 %v538_v38, %v142_v4  ;;  %v2643_v38 = vld [vmem:[%s3872_s8] sm:$0xff] }
  0xd1   :  { %v572_v40 = vmax.f32 %v526_v37, 0.0  ;;  %v2644_v37 = vld [vmem:[%s3872_s8 + $0x8] sm:$0xff] }
  0xd2   :  { %v573_v41 = vmax.f32 %v539_v39, 0.0 }
  0xd3   :  { %v588_v42 = vpack.c.bf16 %v572_v40, %v572_v40  ;;  %v2708_v40 = vld [vmem:[%s3902_s24] ss:$0 sm:$0xff] }
  0xd4   :  { %v589_v43 = vpack.c.bf16 %v573_v41, %v573_v41 }
  0xd5   :  { %v551_v44 = vpop.f32.mrf.mxu2  ;;  %695 = vmatpush.bf16.xpose.msrb.mxu0 %v588_v42 }
  0xd6   :  { %v552_v47 = vadd.f32 %v551_v44, %v142_v4  ;;  %v564_v48 = vpop.f32.mrf.mxu3  ;;  %709 = vmatpush.bf16.xpose.msrb.mxu1 %v589_v43  ;;  %v527_v49 = vpop.f32.mrf.mxu0 }
  0xd7   :  { %v565_v53 = vadd.f32 %v564_v48, %v142_v4  ;;  %v540_v54 = vpop.f32.mrf.mxu1  ;;  %v2408_v4 = vor.u32 %v2638_v0, %v2405_v1 }
  0xd8   :  { %v574_v55 = vmax.f32 %v552_v47, 0.0 }
  0xd9   :  { %v575_v57 = vmax.f32 %v565_v53, 0.0  ;;  %v2709_v53 = vld [vmem:[%s3873_s9] ss:$0 sm:$0xff] }
  0xda   :  { %v590_v59 = vpack.c.bf16 %v574_v55, %v574_v55 }
  0xdb   :  { %v591_v60 = vpack.c.bf16 %v575_v57, %v575_v57 }
  0xdc   :  { %723 = vmatpush.bf16.xpose.msrb.mxu2 %v590_v59  ;;  %696 = vmatmul.bf16.vlgmr.msrb.gmra.mxu0 %v2396_v56 }
  0xdd   :  { %737 = vmatpush.bf16.xpose.msrb.mxu3 %v591_v60  ;;  %v553_v63 = vpop.f32.mrf.mxu2  ;;  %710 = vmatmul.bf16.vlgmr.msrb.gmra.mxu1 %v2400_v58 }
  0xde   :  { %v566_v2 = vpop.f32.mrf.mxu3  ;;  %765 = vmatpush.bf16.msra.mxu0 %v756_v9  ;;  %824 = vmatpush.bf16.msra.mxu1 %v2644_v37 }
  0xe2   :  { %825 = vmatpush.bf16.msra.mxu1 %v2643_v38 }
  0xe3   :  { %724 = vmatmul.bf16.vlgmr.msrb.gmra.mxu2 %v2404_v3 }
  0xe4   :  { %738 = vmatmul.bf16.vlgmr.msrb.gmra.mxu3 %v2408_v4 }
 0x139   :  { %v641_v5 = vpop.f32.mrf.mxu0  ;;  %v655_v6 = vpop.f32.mrf.mxu1 }
 0x13a   :  { %v656_v14 = vadd.f32 %v655_v6, %v641_v5 }
 0x141   :  { %v643_v8 = vpop.f32.mrf.mxu0  ;;  %v657_v12 = vpop.f32.mrf.mxu1 }
 0x142   :  { %v658_v16 = vadd.f32 %v657_v12, %v643_v8 }
 0x147   :  { %v683_v11 = vpop.f32.mrf.mxu3 }
 0x148   :  { %v669_v10 = vpop.f32.mrf.mxu2 }
 0x149   :  { %v670_v18 = vadd.f32 %v669_v10, %v656_v14 }
 0x14b   :  { %v684_v20 = vadd.f32 %v683_v11, %v670_v18 }
 0x14f   :  { %v685_v17 = vpop.f32.mrf.mxu3 }
 0x150   :  { %v671_v15 = vpop.f32.mrf.mxu2 }
 0x151   :  { %v672_v19 = vadd.f32 %v671_v15, %v658_v16  ;;  %v3467_v16 = vld [vmem:[%s3871_s7] sm:$0xff] }
 0x153   :  { %v686_v23 = vadd.f32 %v685_v17, %v672_v19  ;;  %v3474_v19 = vld [vmem:[%s3871_s7 + $0x8] sm:$0xff] }
 0x159   :  { %v697_v13 = vpop.f32.mrf.mxu0 }
 0x15a   :  { %v711_v52 = vpop.f32.mrf.mxu1  ;;  %v698_v24 = vadd.f32 %v697_v13, %v684_v20 }
 0x15c   :  { %v712_v28 = vadd.f32 %v711_v52, %v698_v24 }
 0x161   :  { %v699_v21 = vpop.f32.mrf.mxu0 }
 0x162   :  { %v700_v26 = vadd.f32 %v699_v21, %v686_v23  ;;  %v713_v27 = vpop.f32.mrf.mxu1  ;;  %v3481_v23 = vld [vmem:[%s3871_s7 + $0x10] sm:$0xff] }
 0x164   :  { %v714_v29 = vadd.f32 %v713_v27, %v700_v26  ;;  %v3488_v27 = vld [vmem:[%s3871_s7 + $0x18] sm:$0xff] }
 0x166   :  { %v725_v22 = vpop.f32.mrf.mxu2 }
 0x167   :  { %v739_v25 = vpop.f32.mrf.mxu3  ;;  %v726_v30 = vadd.f32 %v725_v22, %v712_v28 }
 0x169   :  { %v740_v34 = vadd.f32 %v739_v25, %v726_v30 }
 0x16e   :  { %v727_v31 = vpop.f32.mrf.mxu2 }
 0x16f   :  { %v728_v32 = vadd.f32 %v727_v31, %v714_v29  ;;  %v741_v33 = vpop.f32.mrf.mxu3  ;;  %v3495_v31 = vld [vmem:[%s3871_s7 + $0x20] sm:$0xff] }
 0x171   :  { %v742_v35 = vadd.f32 %v741_v33, %v728_v32 }
 0x173   :  { %v744_v36 = vpack.c.bf16 %v742_v35, %v740_v34  ;;  %v3505_v35 = vld [vmem:[%s3871_s7 + $0x28] sm:$0xff] }
 0x175   :  { %2409 = vmatmul.msk.bf16.vlgmr.msra.gmra.mxu0 %vm750_vm1, %v744_v36 }
 0x1f2   :  { %v767_v39 = vpop.f32.mrf.mxu0 }
 0x1f3   :  { %v768_v41 = vadd.f32 %v2708_v40, %v767_v39  ;;  %v3512_v39 = vld [vmem:[%s3871_s7 + $0x30] sm:$0xff] }
 0x1f5   :  { %v772_v43 = vmax.f32 %v768_v41, 0.0 }
 0x1f7   :  { %v3426_v48 = vadd.f32 %v774_v45, %v772_v43  ;;  %v3519_v43 = vld [vmem:[%s3871_s7 + $0x38] sm:$0xff] }
 0x1fa   :  { %v769_v42 = vpop.f32.mrf.mxu0 }
 0x1fb   :  { %v770_v44 = vadd.f32 %v2708_v40, %v769_v42 }
 0x1fd   :  { %v773_v47 = vmax.f32 %v770_v44, 0.0 }
 0x1ff   :  { %v3428_v49 = vadd.f32 %v775_v46, %v773_v47 }
 0x201   :  { %v794_v50 = vpack.c.bf16 %v3428_v49, %v3426_v48 }
 0x203   :  { %2418 = vmatmul.msk.bf16.vlgmr.msra.gmra.mxu1 %vm814_vm2, %v794_v50 }
 0x280   :  { %v827_v51 = vpop.f32.mrf.mxu1 }
 0x281   :  { %v828_v55 = vadd.f32 %v2709_v53, %v827_v51 }
 0x288   :  { %v829_v54 = vpop.f32.mrf.mxu1 }
 0x289   :  { %v830_v56 = vadd.f32 %v2709_v53, %v829_v54 }
 0x28b   :  { %v2683_v57 = vpack.i.bf16 %v830_v56, %v828_v55  ;;  %v3439_v58 = vpack.c.bf16 %v830_v56, %v828_v55 }
 0x28d   :  { %2684 = vrot.lane.b32.xlu1 %v2683_v57, %s2834_s30  ;;  %2679 = vrot.lane.b32.xlu0 %v2683_v57, %s2835_s26 }
 0x295   :  { %2689 = vrot.lane.b32.xlu1 %v2683_v57, %s2836_s4 }
 0x29d   :  { %860 = vrot.lane.b32.xlu1 %v3439_v58, %s2837_s0 }
 0x2ff   :  { %v2685_v59 = vpop.permute.xlu1 %2684  ;;  %v2680_v60 = vpop.permute.xlu0 %2679 }
 0x300   :  { %v2682_v61 = vunpack.i.h.bf16 %v2680_v60  ;;  %v2681_v62 = vunpack.i.l.bf16 %v2680_v60  ;;  %v2687_v0 = vunpack.i.h.bf16 %v2685_v59  ;;  %v2686_v1 = vunpack.i.l.bf16 %v2685_v59 }
 0x302   :  { %v855_v63 = vpack.c.bf16 %v2682_v61, %v2681_v62  ;;  %v3444_v5 = vpack.c.bf16 %v2687_v0, %v2686_v1 }
 0x304   :  { %866 = vrot.lane.b32.xlu2 %v855_v63, %s2837_s0 }
 0x307   :  { %v2690_v2 = vpop.permute.xlu1 %2689 }
 0x308   :  { %v2692_v3 = vunpack.i.h.bf16 %v2690_v2  ;;  %v2691_v4 = vunpack.i.l.bf16 %v2690_v2 }
 0x30a   :  { %v3446_v6 = vpack.c.bf16 %v2692_v3, %v2691_v4 }
 0x30c   :  { %862 = vrot.lane.b32.xlu0 %v3446_v6, %s2837_s0  ;;  %864 = vrot.lane.b32.xlu2 %v3444_v5, %s2837_s0 }
 0x30f   :  { %v861_v13 = vpop.permute.xlu1 %860 }
 0x310   :  { %v881_v15 = vsel %vm750_vm1, %v861_v13, 0 }
 0x314   :  { %1020 = vrot.lane.b32.xlu0 %v855_v63, %s2838_s23 }
 0x35e   :  { %v867_v7 = vpop.permute.xlu2 %866 }
 0x35f   :  { %v890_v8 = vsel %vm750_vm1, %v867_v7, 0 }
 0x360   :  { %896 = vmatpush.bf16.xpose.msra.mxu2 %v890_v8 }
 0x366   :  { %v865_v9 = vpop.permute.xlu2 %864 }
 0x367   :  { %v887_v10 = vsel %vm750_vm1, %v865_v9, 0 }
 0x368   :  { %897 = vmatpush.bf16.xpose.msra.mxu2 %v887_v10 }
 0x37e   :  { %v863_v11 = vpop.permute.xlu0 %862 }
 0x37f   :  { %v884_v12 = vsel %vm750_vm1, %v863_v11, 0 }
 0x380   :  { %898 = vmatpush.bf16.xpose.msra.mxu2 %v884_v12 }
 0x386   :  { %v1021_v14 = vpop.permute.xlu0 %1020 }
 0x387   :  { %1042 = vmatpush.bf16.msra.mxu3 %v1021_v14 }
 0x388   :  { %899 = vmatpush.bf16.xpose.msra.mxu2 %v881_v15 }
 0x38f   :  { %2419 = vmatmul.msk.bf16.vlgmr.msra.gmra.mxu2 %vm750_vm1, %v3439_v58 }
 0x39f   :  { %2420 = vmatmul.msk.bf16.gmra.mxu2 %vm750_vm1, %v3446_v6 }
 0x3af   :  { %2421 = vmatmul.msk.bf16.gmra.mxu2 %vm750_vm1, %v3444_v5 }
 0x3bf   :  { %2422 = vmatmul.msk.bf16.gmra.mxu2 %vm750_vm1, %v855_v63 }
 0x412   :  { %v901_v17 = vpop.f32.mrf.mxu2 }
 0x413   :  { %v902_v52 = vadd.f32 %v901_v17, %v3467_v16 }
 0x415   :  { %v922_v18 = vsel %vm921_vm3, %v902_v52, -inf }
 0x416   :  { %923 = vmax.xlane.f32.xlu2 %v922_v18 }
 0x41a   :  { %v903_v20 = vpop.f32.mrf.mxu2 }
 0x41b   :  { %v904_v21 = vadd.f32 %v903_v20, %v3474_v19 }
 0x41d   :  { %v925_v22 = vsel %vm921_vm3, %v904_v21, -inf }
 0x41e   :  { %926 = vmax.xlane.f32.xlu0 %v925_v22 }
 0x422   :  { %v906_v24 = vpop.f32.mrf.mxu2 }
 0x423   :  { %v907_v25 = vadd.f32 %v906_v24, %v3481_v23 }
 0x425   :  { %v928_v26 = vsel %vm921_vm3, %v907_v25, -inf }
 0x426   :  { %929 = vmax.xlane.f32.xlu1 %v928_v26 }
 0x42a   :  { %v908_v28 = vpop.f32.mrf.mxu2 }
 0x42b   :  { %v909_v29 = vadd.f32 %v908_v28, %v3488_v27 }
 0x42d   :  { %v931_v30 = vsel %vm921_vm3, %v909_v29, -inf }
 0x42e   :  { %932 = vmax.xlane.f32.xlu2 %v931_v30 }
 0x432   :  { %v911_v32 = vpop.f32.mrf.mxu2 }
 0x433   :  { %v3498_v33 = vadd.f32 %v911_v32, %v3495_v31 }
 0x435   :  { %v934_v34 = vsel %vm921_vm3, %v3498_v33, -inf }
 0x436   :  { %935 = vmax.xlane.f32.xlu2 %v934_v34 }
 0x43a   :  { %v913_v36 = vpop.f32.mrf.mxu2 }
 0x43b   :  { %v914_v37 = vadd.f32 %v913_v36, %v3505_v35 }
 0x43d   :  { %v937_v38 = vsel %vm921_vm3, %v914_v37, -inf }
 0x43e   :  { %938 = vmax.xlane.f32.xlu0 %v937_v38 }
 0x442   :  { %v916_v40 = vpop.f32.mrf.mxu2 }
 0x443   :  { %v917_v41 = vadd.f32 %v916_v40, %v3512_v39 }
 0x445   :  { %v940_v42 = vsel %vm921_vm3, %v917_v41, -inf }
 0x446   :  { %941 = vmax.xlane.f32.xlu1 %v940_v42 }
 0x44a   :  { %v918_v44 = vpop.f32.mrf.mxu2 }
 0x44b   :  { %v919_v45 = vadd.f32 %v918_v44, %v3519_v43 }
 0x44d   :  { %v943_v46 = vsel %vm921_vm3, %v919_v45, -inf }
 0x44e   :  { %944 = vmax.xlane.f32.xlu2 %v943_v46 }
 0x452   :  { %1014 = vrot.lane.b32.xlu0 %v3439_v58, %s2838_s23 }
 0x489   :  { %v924_v47 = vpop.xlane.xlu2 %923 }
 0x48a   :  { %v946_v50 = vsub.f32 %v902_v52, %v924_v47 }
 0x48c   :  { %v954_v51 = vmul.f32 1.442695, %v946_v50 }
 0x48e   :  { %2725 = vpow2.f32 %v954_v51 }
 0x491   :  { %v927_v53 = vpop.xlane.xlu0 %926 }
 0x492   :  { %v947_v54 = vsub.f32 %v904_v21, %v927_v53 }
 0x494   :  { %v3525_v55 = vpop.eup %2725  ;;  %v956_v56 = vmul.f32 1.442695, %v947_v54 }
 0x495   :  { %v970_v57 = vsel %vm921_vm3, %v3525_v55, 0.0 }
 0x496   :  { %2727 = vpow2.f32 %v956_v56  ;;  %971 = vadd.xlane.f32.xlu1 %v970_v57 }
 0x499   :  { %v930_v59 = vpop.xlane.xlu1 %929 }
 0x49a   :  { %v948_v60 = vsub.f32 %v907_v25, %v930_v59 }
 0x49c   :  { %v2728_v61 = vpop.eup %2727  ;;  %v958_v62 = vmul.f32 1.442695, %v948_v60 }
 0x49d   :  { %v973_v58 = vsel %vm921_vm3, %v2728_v61, 0.0 }
 0x49e   :  { %2729 = vpow2.f32 %v958_v62  ;;  %974 = vadd.xlane.f32.xlu2 %v973_v58 }
 0x4a1   :  { %v933_v1 = vpop.xlane.xlu2 %932 }
 0x4a2   :  { %v949_v13 = vsub.f32 %v909_v29, %v933_v1 }
 0x4a4   :  { %v2730_v63 = vpop.eup %2729  ;;  %v960_v14 = vmul.f32 1.442695, %v949_v13 }
 0x4a5   :  { %v976_v0 = vsel %vm921_vm3, %v2730_v63, 0.0 }
 0x4a6   :  { %977 = vadd.xlane.f32.xlu0 %v976_v0 }
 0x4a9   :  { %v936_v7 = vpop.xlane.xlu2 %935 }
 0x4aa   :  { %v950_v17 = vsub.f32 %v3498_v33, %v936_v7 }
 0x4ac   :  { %v962_v18 = vmul.f32 1.442695, %v950_v17 }
 0x4af   :  { %1018 = vrot.lane.b32.xlu1 %v3444_v5, %s2838_s23 }
 0x4b1   :  { %v939_v2 = vpop.xlane.xlu0 %938 }
 0x4b2   :  { %v951_v3 = vsub.f32 %v914_v37, %v939_v2 }
 0x4b4   :  { %v964_v4 = vmul.f32 1.442695, %v951_v3  ;;  %v1068_v3 = vld [vmem:[%s3874_s10] sm:$0xf] }
 0x4b6   :  { %2731 = vpow2.f32 %v964_v4  ;;  %1016 = vrot.lane.b32.xlu2 %v3446_v6, %s2838_s23  ;;  %v1073_v4 = vsel %vm754_vm0, %v1068_v3, 0 }
 0x4b7   :  { %1082 = vmatpush.bf16.msrb.mxu0 %v1073_v4 }
 0x4b9   :  { %v942_v5 = vpop.xlane.xlu1 %941 }
 0x4ba   :  { %v952_v6 = vsub.f32 %v917_v41, %v942_v5 }
 0x4bc   :  { %v2732_v8 = vpop.eup %2731  ;;  %v966_v20 = vmul.f32 1.442695, %v952_v6 }
 0x4bd   :  { %v985_v9 = vsel %vm921_vm3, %v2732_v8, 0.0 }
 0x4be   :  { %986 = vadd.xlane.f32.xlu0 %v985_v9 }
 0x4c1   :  { %v945_v10 = vpop.xlane.xlu2 %944 }
 0x4c2   :  { %v953_v11 = vsub.f32 %v919_v45, %v945_v10  ;;  %v2428_v10 = vld [vmem:[%s3874_s10 + $0x4] sm:$0xf] }
 0x4c4   :  { %v968_v12 = vmul.f32 1.442695, %v953_v11  ;;  %v1015_v38 = vpop.permute.xlu0 %1014  ;;  %v1101_v11 = vsel %vm754_vm0, %v2428_v10, 0 }
 0x4c5   :  { %1110 = vmatpush.bf16.msrb.mxu1 %v1101_v11  ;;  %v2645_v11 = vld [vmem:[%s3878_s14] sm:$0xff] }
 0x4c6   :  { %2733 = vpow2.f32 %v968_v12  ;;  %v2430_v12 = vld [vmem:[%s3874_s10 + $0x8] sm:$0xf] }
 0x4c7   :  { %2735 = vpow2.f32 %v960_v14  ;;  %v1126_v13 = vsel %vm754_vm0, %v2430_v12, 0 }
 0x4c8   :  { %2737 = vpow2.f32 %v962_v18  ;;  %1135 = vmatpush.bf16.msra.mxu0 %v1126_v13 }
 0x4c9   :  { %2739 = vpow2.f32 %v966_v20 }
 0x4cc   :  { %v3536_v15 = vpop.eup %2733 }
 0x4cd   :  { %v991_v52 = vsel %vm921_vm3, %v3536_v15, 0.0  ;;  %v2736_v21 = vpop.eup %2735 }
 0x4ce   :  { %992 = vadd.xlane.f32.xlu0 %v991_v52  ;;  %v979_v22 = vsel %vm921_vm3, %v2736_v21, 0.0  ;;  %v2738_v24 = vpop.eup %2737 }
 0x4cf   :  { %v2740_v25 = vpop.eup %2739  ;;  %v982_v26 = vsel %vm921_vm3, %v2738_v24, 0.0 }
 0x4d0   :  { %v988_v28 = vsel %vm921_vm3, %v2740_v25, 0.0 }
 0x4d9   :  { %980 = vadd.xlane.f32.xlu1 %v979_v22 }
 0x4df   :  { %983 = vadd.xlane.f32.xlu2 %v982_v26 }
 0x4e1   :  { %989 = vadd.xlane.f32.xlu1 %v988_v28 }
 0x509   :  { %v972_v29 = vpop.xlane.xlu1 %971 }
 0x511   :  { %v975_v30 = vpop.xlane.xlu2 %974 }
 0x512   :  { %2741 = vrcp.f32 %v975_v30 }
 0x513   :  { %2743 = vrcp.f32 %v972_v29  ;;  %v2710_v29 = vld [vmem:[%s3875_s11] ss:$0 sm:$0xff] }
 0x518   :  { %v2742_v33 = vpop.eup %2741 }
 0x519   :  { %v1017_v34 = vpop.permute.xlu2 %1016  ;;  %v2744_v36 = vpop.eup %2743  ;;  %v1003_v37 = vmul.f32 %v2742_v33, %v2728_v61 }
 0x51a   :  { %v1002_v40 = vmul.f32 %v2744_v36, %v3525_v55  ;;  %v978_v42 = vpop.xlane.xlu0 %977 }
 0x51b   :  { %2745 = vrcp.f32 %v978_v42 }
 0x51c   :  { %v1010_v41 = vpack.c.bf16 %v1003_v37, %v1002_v40 }
 0x521   :  { %v1019_v32 = vpop.permute.xlu1 %1018  ;;  %v2746_v45 = vpop.eup %2745 }
 0x522   :  { %1043 = vmatpush.bf16.msra.mxu3 %v1019_v32  ;;  %v1004_v47 = vmul.f32 %v2746_v45, %v2730_v63 }
 0x526   :  { %1044 = vmatpush.bf16.msra.mxu3 %v1017_v34 }
 0x52a   :  { %1045 = vmatpush.bf16.msra.mxu3 %v1015_v38 }
 0x52d   :  { %2423 = vmatmul.msk.bf16.vlgmr.msra.gmra.mxu3 %vm921_vm3, %v1010_v41 }
 0x531   :  { %v987_v54 = vpop.xlane.xlu0 %986 }
 0x541   :  { %v993_v62 = vpop.xlane.xlu0 %992 }
 0x54c   :  { %v981_v44 = vpop.xlane.xlu1 %980 }
 0x54d   :  { %2747 = vrcp.f32 %v981_v44 }
 0x552   :  { %v984_v51 = vpop.xlane.xlu2 %983 }
 0x553   :  { %v2748_v46 = vpop.eup %2747  ;;  %2749 = vrcp.f32 %v984_v51 }
 0x554   :  { %v1005_v50 = vmul.f32 %v2748_v46, %v2736_v21  ;;  %2751 = vrcp.f32 %v987_v54  ;;  %v990_v60 = vpop.xlane.xlu1 %989  ;;  %v2839_v54 = vmov 32.0  }
 0x555   :  { %2753 = vrcp.f32 %v990_v60 }
 0x556   :  { %v1011_v53 = vpack.c.bf16 %v1005_v50, %v1004_v47  ;;  %2755 = vrcp.f32 %v993_v62 }
 0x557   :  { %2757 = vrcp.f32 %v2839_v54 }
 0x558   :  { %2424 = vmatmul.msk.bf16.gmra.mxu3 %vm921_vm3, %v1011_v53 }
 0x559   :  { %v2750_v55 = vpop.eup %2749 }
 0x55a   :  { %v2752_v56 = vpop.eup %2751  ;;  %v1006_v57 = vmul.f32 %v2750_v55, %v2738_v24 }
 0x55b   :  { %v1007_v59 = vmul.f32 %v2752_v56, %v2732_v8  ;;  %v2754_v58 = vpop.eup %2753 }
 0x55c   :  { %v2756_v63 = vpop.eup %2755  ;;  %v1008_v0 = vmul.f32 %v2754_v58, %v2740_v25 }
 0x55d   :  { %v1012_v61 = vpack.c.bf16 %v1007_v59, %v1006_v57  ;;  %v1009_v1 = vmul.f32 %v2756_v63, %v3536_v15  ;;  %v2432_v15 = vld [vmem:[%s3874_s10 + $0xc] sm:$0xf]  ;;  %v2758_v55 = vpop.eup %2757 }
 0x55e   :  { %v1151_v17 = vsel %vm754_vm0, %v2432_v15, 0  ;;  %v1178_v56 = vmul.f32 32.0, %v2758_v55  ;;  %vm1182_vm4 = vweird.f32 %v2758_v55 }
 0x55f   :  { %v1013_v2 = vpack.c.bf16 %v1009_v1, %v1008_v0  ;;  %1160 = vmatpush.bf16.msra.mxu1 %v1151_v17 }
 0x560   :  { %v1179_v57 = vsub.f32 1.0, %v1178_v56 }
 0x562   :  { %v1180_v59 = vmul.f32 %v2758_v55, %v1179_v57 }
 0x568   :  { %2425 = vmatmul.msk.bf16.gmra.mxu3 %vm921_vm3, %v1012_v61 }
 0x578   :  { %2426 = vmatmul.msk.bf16.gmra.mxu3 %vm921_vm3, %v1013_v2 }
 0x5b0   :  { %v1047_v7 = vpop.f32.mrf.mxu3 }
 0x5b8   :  { %v1049_v8 = vpop.f32.mrf.mxu3 }
 0x5b9   :  { %v1067_v9 = vpack.c.bf16 %v1049_v8, %v1047_v7  ;;  %v2646_v7 = vld [vmem:[%s3878_s14 + $0x8] sm:$0xff] }
 0x5bb   :  { %2427 = vmatmul.msk.bf16.vlgmr.msrb.gmra.mxu0 %vm750_vm1, %v1067_v9 }
 0x5bc   :  { %1261 = vmatpush.bf16.msrb.mxu0 %v2646_v7 }
 0x5c0   :  { %1262 = vmatpush.bf16.msrb.mxu0 %v2645_v11 }
 0x5db   :  { %v1052_v14 = vpop.f32.mrf.mxu3 }
 0x5e3   :  { %v1054_v5 = vpop.f32.mrf.mxu3 }
 0x5e4   :  { %v1094_v52 = vpack.c.bf16 %v1054_v5, %v1052_v14 }
 0x5e6   :  { %2429 = vmatmul.msk.bf16.vlgmr.msrb.gmra.mxu1 %vm750_vm1, %v1094_v52 }
 0x5eb   :  { %v1057_v6 = vpop.f32.mrf.mxu3 }
 0x5f3   :  { %v1059_v18 = vpop.f32.mrf.mxu3 }
 0x5f4   :  { %v1119_v20 = vpack.c.bf16 %v1059_v18, %v1057_v6 }
 0x5f6   :  { %2431 = vmatmul.msk.bf16.vlgmr.msra.gmra.mxu0 %vm750_vm1, %v1119_v20 }
 0x5fb   :  { %v1062_v21 = vpop.f32.mrf.mxu3 }
 0x603   :  { %v1064_v22 = vpop.f32.mrf.mxu3 }
 0x604   :  { %v1144_v24 = vpack.c.bf16 %v1064_v22, %v1062_v21 }
 0x606   :  { %2433 = vmatmul.msk.bf16.vlgmr.msra.gmra.mxu1 %vm750_vm1, %v1144_v24 }
 0x638   :  { %v1084_v25 = vpop.f32.mrf.mxu0 }
 0x639   :  { %v1092_v33 = vadd.f32 %v2710_v29, %v1084_v25 }
 0x640   :  { %v1086_v28 = vpop.f32.mrf.mxu0 }
 0x641   :  { %v1093_v40 = vadd.f32 %v2710_v29, %v1086_v28  ;;  %v2711_v28 = vld [vmem:[%s3876_s12] ss:$0 sm:$0xff] }
 0x663   :  { %v1112_v26 = vpop.f32.mrf.mxu1 }
 0x664   :  { %v1117_v34 = vadd.f32 %v1112_v26, %v1092_v33  ;;  %v2712_v33 = vld [vmem:[%s3877_s13] ss:$0 sm:$0xff] }
 0x66b   :  { %v1114_v30 = vpop.f32.mrf.mxu1 }
 0x66c   :  { %v1118_v44 = vadd.f32 %v1114_v30, %v1093_v40 }
 0x673   :  { %v1137_v32 = vpop.f32.mrf.mxu0 }
 0x674   :  { %v1142_v36 = vadd.f32 %v1137_v32, %v1117_v34 }
 0x67b   :  { %v1139_v42 = vpop.f32.mrf.mxu0 }
 0x67c   :  { %v1143_v46 = vadd.f32 %v1139_v42, %v1118_v44  ;;  %v2650_v42 = vld [vmem:[%s3880_s16 + $0x18] sm:$0xff]  ;;  %v2649_v44 = vld [vmem:[%s3880_s16 + $0x10] sm:$0xff] }
 0x67d   :  { %1314 = vmatpush.bf16.msrb.mxu1 %v2650_v42  ;;  %v2716_v42 = vld [vmem:[%s3883_s19] ss:$0 sm:$0xff] }
 0x681   :  { %1315 = vmatpush.bf16.msrb.mxu1 %v2649_v44 }
 0x683   :  { %v1162_v37 = vpop.f32.mrf.mxu1 }
 0x684   :  { %v1167_v38 = vadd.f32 %v1162_v37, %v1142_v36 }
 0x686   :  { %v1169_v41 = vadd.f32 %v1167_v38, %v3426_v48  ;;  %v1181_v48 = vadd.f32 %v2758_v55, %v1180_v59  ;;  %v2714_v59 = vld [vmem:[%s3881_s17] ss:$0 sm:$0xff] }
 0x688   :  { %v1171_v45 = vsel %vm814_vm2, %v1169_v41, 0.0  ;;  %v3577_v60 = vsel %vm1182_vm4, %v2758_v55, %v1181_v48 }
 0x689   :  { %1172 = vadd.xlane.f32.xlu2 %v1171_v45  ;;  %v2648_v45 = vld [vmem:[%s3880_s16 + $0x8] sm:$0xff] }
 0x68a   :  { %1316 = vmatpush.bf16.msrb.mxu1 %v2648_v45 }
 0x68b   :  { %v1164_v47 = vpop.f32.mrf.mxu1 }
 0x68c   :  { %v1168_v50 = vadd.f32 %v1164_v47, %v1143_v46  ;;  %v2647_v46 = vld [vmem:[%s3880_s16] sm:$0xff] }
 0x68e   :  { %v1170_v51 = vadd.f32 %v1168_v50, %v3428_v49  ;;  %1317 = vmatpush.bf16.msrb.mxu1 %v2647_v46  ;;  %v2713_v50 = vld [vmem:[%s3879_s15] ss:$0 sm:$0xff] }
 0x690   :  { %v1174_v53 = vsel %vm814_vm2, %v1170_v51, 0.0 }
 0x691   :  { %1175 = vadd.xlane.f32.xlu1 %v1174_v53 }
 0x6fc   :  { %v1173_v61 = vpop.xlane.xlu2 %1172 }
 0x6fd   :  { %v1184_v62 = vmul.f32 %v3577_v60, %v1173_v61 }
 0x6ff   :  { %v1186_v58 = vsub.f32 %v1169_v41, %v1184_v62 }
 0x701   :  { %v1188_v63 = vmul.f32 %v1186_v58, %v1186_v58 }
 0x703   :  { %v1190_v49 = vsel %vm814_vm2, %v1188_v63, 0.0 }
 0x704   :  { %1191 = vadd.xlane.f32.xlu0 %v1190_v49  ;;  %v1176_v0 = vpop.xlane.xlu1 %1175 }
 0x705   :  { %v1185_v1 = vmul.f32 %v3577_v60, %v1176_v0 }
 0x707   :  { %v1187_v2 = vsub.f32 %v1170_v51, %v1185_v1 }
 0x709   :  { %v1189_v3 = vmul.f32 %v1187_v2, %v1187_v2 }
 0x70b   :  { %v1193_v4 = vsel %vm814_vm2, %v1189_v3, 0.0 }
 0x70c   :  { %1194 = vadd.xlane.f32.xlu2 %v1193_v4 }
 0x777   :  { %v1192_v8 = vpop.xlane.xlu0 %1191 }
 0x778   :  { %v1196_v9 = vmul.f32 %v1192_v8, %v3577_v60 }
 0x77a   :  { %v1198_v10 = vadd.f32 1e-05, %v1196_v9 }
 0x77c   :  { %2759 = vrsqrt.f32 %v1198_v10  ;;  %vm1206_vm6 = vweird.f32 %v1198_v10 }
 0x77f   :  { %v1195_v12 = vpop.xlane.xlu2 %1194 }
 0x780   :  { %v1197_v13 = vmul.f32 %v1195_v12, %v3577_v60 }
 0x782   :  { %v2760_v14 = vpop.eup %2759  ;;  %v1199_v15 = vadd.f32 1e-05, %v1197_v13 }
 0x783   :  { %v1201_v5 = vmul.f32 %v2760_v14, %v1198_v10  ;;  %vm1207_vm5 = vweird.f32 %v2760_v14 }
 0x784   :  { %2761 = vrsqrt.f32 %v1199_v15  ;;  %vm1208_vm7 = vmor %vm1206_vm6, %vm1207_vm5  ;;  %vm1216_vm9 = vweird.f32 %v1199_v15 }
 0x785   :  { %v1202_v17 = vmul.f32 %v2760_v14, %v1201_v5 }
 0x787   :  { %v1203_v52 = vmul.f32 0.5, %v1202_v17 }
 0x789   :  { %v1204_v6 = vsub.f32 1.5, %v1203_v52  ;;  %v2651_v52 = vld [vmem:[%s3872_s8 + $0x10] sm:$0xff] }
 0x78a   :  { %v2762_v18 = vpop.eup %2761 }
 0x78b   :  { %v1205_v20 = vmul.f32 %v2760_v14, %v1204_v6  ;;  %v1211_v21 = vmul.f32 %v2762_v18, %v1199_v15  ;;  %vm1217_vm8 = vweird.f32 %v2762_v18 }
 0x78c   :  { %vm1218_vm10 = vmor %vm1216_vm9, %vm1217_vm8 }
 0x78d   :  { %v1212_v22 = vmul.f32 %v2762_v18, %v1211_v21  ;;  %v1209_v24 = vsel %vm1208_vm7, %v2760_v14, %v1205_v20  ;;  %v2652_v14 = vld [vmem:[%s3872_s8 + $0x18] sm:$0xff] }
 0x78e   :  { %v1220_v29 = vmul.f32 %v1209_v24, %v1186_v58  ;;  %1426 = vmatpush.bf16.msra.mxu0 %v2652_v14 }
 0x78f   :  { %v1213_v25 = vmul.f32 0.5, %v1212_v22 }
 0x790   :  { %v1225_v34 = vmul.f32 %v2711_v28, %v1220_v29 }
 0x791   :  { %v1214_v26 = vsub.f32 1.5, %v1213_v25 }
 0x792   :  { %v1230_v38 = vadd.f32 %v2712_v33, %v1225_v34  ;;  %1427 = vmatpush.bf16.msra.mxu0 %v2651_v52 }
 0x793   :  { %v1215_v30 = vmul.f32 %v2762_v18, %v1214_v26 }
 0x795   :  { %v1219_v32 = vsel %vm1218_vm10, %v2762_v18, %v1215_v30 }
 0x796   :  { %v1221_v36 = vmul.f32 %v1219_v32, %v1187_v2 }
 0x798   :  { %v1226_v37 = vmul.f32 %v2711_v28, %v1221_v36 }
 0x79a   :  { %v1231_v40 = vadd.f32 %v2712_v33, %v1226_v37  ;;  %v2715_v37 = vld [vmem:[%s3882_s18] ss:$0 sm:$0xff] }
 0x79c   :  { %v1232_v41 = vpack.c.bf16 %v1231_v40, %v1230_v38 }
 0x79e   :  { %2442 = vmatmul.msk.bf16.vlgmr.msrb.gmra.mxu0 %vm814_vm2, %v1232_v41 }
 0x81b   :  { %v1264_v47 = vpop.f32.mrf.mxu0 }
 0x81c   :  { %v1265_v51 = vadd.f32 %v2713_v50, %v1264_v47 }
 0x81e   :  { %v1269_v55 = vmax.f32 %v1265_v51, 0.0 }
 0x823   :  { %v1266_v53 = vpop.f32.mrf.mxu0 }
 0x824   :  { %v1267_v54 = vadd.f32 %v2713_v50, %v1266_v53 }
 0x826   :  { %v1270_v56 = vmax.f32 %v1267_v54, 0.0  ;;  %v2717_v54 = vld [vmem:[%s3873_s9 + $0x1] ss:$0 sm:$0xff] }
 0x828   :  { %v1271_v57 = vpack.c.bf16 %v1270_v56, %v1269_v55 }
 0x82a   :  { %2459 = vmatmul.msk.bf16.vlgmr.msrb.gmra.mxu1 %vm921_vm3, %v1271_v57 }
 0x8a7   :  { %v1319_v48 = vpop.f32.mrf.mxu1 }
 0x8a8   :  { %v1320_v61 = vadd.f32 %v2714_v59, %v1319_v48 }
 0x8aa   :  { %v1324_v62 = vadd.f32 %v1320_v61, %v1230_v38 }
 0x8ac   :  { %v1326_v58 = vsel %vm814_vm2, %v1324_v62, 0.0 }
 0x8ad   :  { %1327 = vadd.xlane.f32.xlu1 %v1326_v58 }
 0x8af   :  { %v1321_v63 = vpop.f32.mrf.mxu1 }
 0x8b0   :  { %v1322_v49 = vadd.f32 %v2714_v59, %v1321_v63 }
 0x8b2   :  { %v1325_v0 = vadd.f32 %v1322_v49, %v1231_v40 }
 0x8b4   :  { %v1329_v1 = vsel %vm814_vm2, %v1325_v0, 0.0 }
 0x8b5   :  { %1330 = vadd.xlane.f32.xlu0 %v1329_v1 }
 0x920   :  { %v1328_v2 = vpop.xlane.xlu1 %1327 }
 0x921   :  { %v1332_v3 = vmul.f32 %v1328_v2, %v3577_v60 }
 0x923   :  { %v1334_v4 = vsub.f32 %v1324_v62, %v1332_v3 }
 0x925   :  { %v1336_v7 = vmul.f32 %v1334_v4, %v1334_v4 }
 0x927   :  { %v1338_v8 = vsel %vm814_vm2, %v1336_v7, 0.0 }
 0x928   :  { %v1331_v9 = vpop.xlane.xlu0 %1330  ;;  %1339 = vadd.xlane.f32.xlu2 %v1338_v8 }
 0x929   :  { %v1333_v10 = vmul.f32 %v1331_v9, %v3577_v60 }
 0x92b   :  { %v1335_v11 = vsub.f32 %v1325_v0, %v1333_v10 }
 0x92d   :  { %v1337_v12 = vmul.f32 %v1335_v11, %v1335_v11 }
 0x92f   :  { %v1341_v13 = vsel %vm814_vm2, %v1337_v12, 0.0 }
 0x930   :  { %1342 = vadd.xlane.f32.xlu1 %v1341_v13 }
 0x99b   :  { %v1340_v15 = vpop.xlane.xlu2 %1339 }
 0x99c   :  { %v1344_v5 = vmul.f32 %v1340_v15, %v3577_v60 }
 0x99e   :  { %v1346_v17 = vadd.f32 1e-05, %v1344_v5 }
 0x9a0   :  { %2763 = vrsqrt.f32 %v1346_v17  ;;  %vm1354_vm12 = vweird.f32 %v1346_v17 }
 0x9a3   :  { %v1343_v6 = vpop.xlane.xlu1 %1342 }
 0x9a4   :  { %v1345_v18 = vmul.f32 %v1343_v6, %v3577_v60 }
 0x9a6   :  { %v2764_v20 = vpop.eup %2763  ;;  %v1347_v21 = vadd.f32 1e-05, %v1345_v18 }
 0x9a7   :  { %v1349_v22 = vmul.f32 %v2764_v20, %v1346_v17  ;;  %vm1355_vm11 = vweird.f32 %v2764_v20 }
 0x9a8   :  { %2765 = vrsqrt.f32 %v1347_v21  ;;  %vm1356_vm13 = vmor %vm1354_vm12, %vm1355_vm11  ;;  %vm1364_vm15 = vweird.f32 %v1347_v21 }
 0x9a9   :  { %v1350_v24 = vmul.f32 %v2764_v20, %v1349_v22 }
 0x9ab   :  { %v1351_v25 = vmul.f32 0.5, %v1350_v24 }
 0x9ad   :  { %v1352_v26 = vsub.f32 1.5, %v1351_v25 }
 0x9ae   :  { %v2766_v28 = vpop.eup %2765 }
 0x9af   :  { %v1353_v29 = vmul.f32 %v2764_v20, %v1352_v26  ;;  %v1359_v30 = vmul.f32 %v2766_v28, %v1347_v21  ;;  %vm1365_vm14 = vweird.f32 %v2766_v28 }
 0x9b0   :  { %vm1366_vm4 = vmor %vm1364_vm15, %vm1365_vm14 }
 0x9b1   :  { %v1360_v32 = vmul.f32 %v2766_v28, %v1359_v30  ;;  %v1357_v33 = vsel %vm1356_vm13, %v2764_v20, %v1353_v29 }
 0x9b2   :  { %v1368_v38 = vmul.f32 %v1357_v33, %v1334_v4 }
 0x9b3   :  { %v1361_v34 = vmul.f32 0.5, %v1360_v32 }
 0x9b4   :  { %v1373_v44 = vmul.f32 %v2715_v37, %v1368_v38 }
 0x9b5   :  { %v1362_v36 = vsub.f32 1.5, %v1361_v34 }
 0x9b6   :  { %v3637_v47 = vadd.f32 %v2716_v42, %v1373_v44 }
 0x9b7   :  { %v1363_v40 = vmul.f32 %v2766_v28, %v1362_v36 }
 0x9b9   :  { %v1367_v41 = vsel %vm1366_vm4, %v2766_v28, %v1363_v40 }
 0x9ba   :  { %v1369_v45 = vmul.f32 %v1367_v41, %v1335_v11 }
 0x9bc   :  { %v1374_v46 = vmul.f32 %v2715_v37, %v1369_v45 }
 0x9be   :  { %v3639_v50 = vadd.f32 %v2716_v42, %v1374_v46 }
 0x9c0   :  { %v1396_v51 = vpack.c.bf16 %v3639_v50, %v3637_v47 }
 0x9c2   :  { %2480 = vmatmul.msk.bf16.vlgmr.msra.gmra.mxu0 %vm814_vm2, %v1396_v51 }
 0xa3f   :  { %v1429_v53 = vpop.f32.mrf.mxu0 }
 0xa40   :  { %v1430_v56 = vadd.f32 %v2717_v54, %v1429_v53 }
 0xa47   :  { %v1431_v55 = vpop.f32.mrf.mxu0 }
 0xa48   :  { %v1432_v57 = vadd.f32 %v2717_v54, %v1431_v55 }
 0xa4a   :  { %v2703_v59 = vpack.i.bf16 %v1432_v57, %v1430_v56  ;;  %v3650_v48 = vpack.c.bf16 %v1432_v57, %v1430_v56 }
 0xa4c   :  { %2704 = vrot.lane.b32.xlu1 %v2703_v59, %s2836_s4  ;;  %2699 = vrot.lane.b32.xlu2 %v2703_v59, %s2834_s30 }
 0xa4d   :  { %2694 = vrot.lane.b32.xlu0 %v2703_v59, %s2835_s26 }
 0xa54   :  { %1462 = vrot.lane.b32.xlu1 %v3650_v48, %s2837_s0 }
 0xaa6   :  { %v2700_v61 = vpop.permute.xlu2 %2699 }
 0xaa7   :  { %v2702_v62 = vunpack.i.h.bf16 %v2700_v61  ;;  %v2701_v58 = vunpack.i.l.bf16 %v2700_v61 }
 0xaa9   :  { %v3654_v63 = vpack.c.bf16 %v2702_v62, %v2701_v58 }
 0xaab   :  { %1466 = vrot.lane.b32.xlu2 %v3654_v63, %s2837_s0 }
 0xabe   :  { %v2705_v3 = vpop.permute.xlu1 %2704 }
 0xabf   :  { %v2695_v49 = vpop.permute.xlu0 %2694  ;;  %v2707_v4 = vunpack.i.h.bf16 %v2705_v3  ;;  %v2706_v7 = vunpack.i.l.bf16 %v2705_v3 }
 0xac0   :  { %v2697_v0 = vunpack.i.h.bf16 %v2695_v49  ;;  %v2696_v1 = vunpack.i.l.bf16 %v2695_v49 }
 0xac1   :  { %v3660_v8 = vpack.c.bf16 %v2707_v4, %v2706_v7 }
 0xac2   :  { %v1457_v2 = vpack.c.bf16 %v2697_v0, %v2696_v1 }
 0xac4   :  { %1468 = vrot.lane.b32.xlu0 %v1457_v2, %s2837_s0  ;;  %1621 = vrot.lane.b32.xlu1 %v1457_v2, %s2838_s23 }
 0xac6   :  { %v1463_v9 = vpop.permute.xlu1 %1462 }
 0xac7   :  { %v1483_v17 = vsel %vm750_vm1, %v1463_v9, 0 }
 0xacc   :  { %1464 = vrot.lane.b32.xlu0 %v3660_v8, %s2837_s0 }
 0xb05   :  { %v1467_v13 = vpop.permute.xlu2 %1466 }
 0xb06   :  { %v1489_v14 = vsel %vm750_vm1, %v1467_v13, 0 }
 0xb36   :  { %v1469_v10 = vpop.permute.xlu0 %1468  ;;  %v1622_v11 = vpop.permute.xlu1 %1621 }
 0xb37   :  { %v1492_v12 = vsel %vm750_vm1, %v1469_v10, 0  ;;  %1643 = vmatpush.bf16.msra.mxu1 %v1622_v11 }
 0xb38   :  { %1498 = vmatpush.bf16.xpose.msrb.mxu3 %v1492_v12 }
 0xb3e   :  { %v1465_v15 = vpop.permute.xlu0 %1464 }
 0xb3f   :  { %v1486_v5 = vsel %vm750_vm1, %v1465_v15, 0 }
 0xb40   :  { %1499 = vmatpush.bf16.xpose.msrb.mxu3 %v1489_v14 }
 0xb48   :  { %1500 = vmatpush.bf16.xpose.msrb.mxu3 %v1486_v5 }
 0xb50   :  { %1501 = vmatpush.bf16.xpose.msrb.mxu3 %v1483_v17 }
 0xb57   :  { %2481 = vmatmul.msk.bf16.vlgmr.msrb.gmra.mxu3 %vm750_vm1, %v3650_v48 }
 0xb67   :  { %2482 = vmatmul.msk.bf16.gmra.mxu3 %vm750_vm1, %v3660_v8 }
 0xb77   :  { %2483 = vmatmul.msk.bf16.gmra.mxu3 %vm750_vm1, %v3654_v63 }
 0xb87   :  { %2484 = vmatmul.msk.bf16.gmra.mxu3 %vm750_vm1, %v1457_v2 }
 0xbda   :  { %v1503_v52 = vpop.f32.mrf.mxu3 }
 0xbdb   :  { %v1504_v6 = vadd.f32 %v1503_v52, %v3467_v16 }
 0xbdd   :  { %v1523_v18 = vsel %vm921_vm3, %v1504_v6, -inf }
 0xbde   :  { %1524 = vmax.xlane.f32.xlu2 %v1523_v18 }
 0xbe2   :  { %v1505_v20 = vpop.f32.mrf.mxu3 }
 0xbe3   :  { %v1506_v21 = vadd.f32 %v1505_v20, %v3474_v19 }
 0xbe5   :  { %v1526_v22 = vsel %vm921_vm3, %v1506_v21, -inf }
 0xbe6   :  { %1527 = vmax.xlane.f32.xlu0 %v1526_v22 }
 0xbea   :  { %v1508_v24 = vpop.f32.mrf.mxu3 }
 0xbeb   :  { %v1509_v25 = vadd.f32 %v1508_v24, %v3481_v23 }
 0xbed   :  { %v1529_v26 = vsel %vm921_vm3, %v1509_v25, -inf }
 0xbee   :  { %1530 = vmax.xlane.f32.xlu1 %v1529_v26 }
 0xbf2   :  { %v1510_v28 = vpop.f32.mrf.mxu3 }
 0xbf3   :  { %v1511_v29 = vadd.f32 %v1510_v28, %v3488_v27 }
 0xbf5   :  { %v1532_v16 = vsel %vm921_vm3, %v1511_v29, -inf }
 0xbf6   :  { %1533 = vmax.xlane.f32.xlu2 %v1532_v16 }
 0xbfa   :  { %v1513_v30 = vpop.f32.mrf.mxu3 }
 0xbfb   :  { %v1514_v32 = vadd.f32 %v1513_v30, %v3495_v31 }
 0xbfd   :  { %v1535_v19 = vsel %vm921_vm3, %v1514_v32, -inf }
 0xbfe   :  { %1536 = vmax.xlane.f32.xlu0 %v1535_v19 }
 0xc02   :  { %v1515_v33 = vpop.f32.mrf.mxu3 }
 0xc03   :  { %v1516_v34 = vadd.f32 %v1515_v33, %v3505_v35 }
 0xc05   :  { %v1538_v23 = vsel %vm921_vm3, %v1516_v34, -inf }
 0xc06   :  { %1539 = vmax.xlane.f32.xlu1 %v1538_v23 }
 0xc0a   :  { %v1518_v36 = vpop.f32.mrf.mxu3 }
 0xc0b   :  { %v1519_v37 = vadd.f32 %v1518_v36, %v3512_v39 }
 0xc0d   :  { %v1541_v27 = vsel %vm921_vm3, %v1519_v37, -inf }
 0xc0e   :  { %1542 = vmax.xlane.f32.xlu2 %v1541_v27 }
 0xc12   :  { %v1520_v38 = vpop.f32.mrf.mxu3 }
 0xc13   :  { %v1521_v40 = vadd.f32 %v1520_v38, %v3519_v43 }
 0xc15   :  { %v1544_v31 = vsel %vm921_vm3, %v1521_v40, -inf }
 0xc16   :  { %1545 = vmax.xlane.f32.xlu0 %v1544_v31 }
 0xc1f   :  { %1615 = vrot.lane.b32.xlu1 %v3650_v48, %s2838_s23 }
 0xc51   :  { %v1525_v41 = vpop.xlane.xlu2 %1524 }
 0xc52   :  { %v1547_v35 = vsub.f32 %v1504_v6, %v1525_v41 }
 0xc54   :  { %v1555_v42 = vmul.f32 1.442695, %v1547_v35 }
 0xc56   :  { %2767 = vpow2.f32 %v1555_v42 }
 0xc59   :  { %v1528_v44 = vpop.xlane.xlu0 %1527 }
 0xc5a   :  { %v1548_v45 = vsub.f32 %v1506_v21, %v1528_v44 }
 0xc5c   :  { %v3693_v46 = vpop.eup %2767  ;;  %v1557_v39 = vmul.f32 1.442695, %v1548_v45 }
 0xc5d   :  { %v1571_v51 = vsel %vm921_vm3, %v3693_v46, 0.0 }
 0xc5e   :  { %2769 = vpow2.f32 %v1557_v39  ;;  %1572 = vadd.xlane.f32.xlu2 %v1571_v51 }
 0xc61   :  { %v1531_v43 = vpop.xlane.xlu1 %1530 }
 0xc62   :  { %v1549_v53 = vsub.f32 %v1509_v25, %v1531_v43 }
 0xc64   :  { %v2770_v54 = vpop.eup %2769  ;;  %v1559_v55 = vmul.f32 1.442695, %v1549_v53 }
 0xc65   :  { %v1574_v56 = vsel %vm921_vm3, %v2770_v54, 0.0 }
 0xc66   :  { %2771 = vpow2.f32 %v1559_v55  ;;  %1575 = vadd.xlane.f32.xlu0 %v1574_v56  ;;  %v2491_v56 = vld [vmem:[%s3874_s10 + $0x14] sm:$0xf] }
 0xc69   :  { %v1534_v2 = vpop.xlane.xlu2 %1533 }
 0xc6a   :  { %v1550_v4 = vsub.f32 %v1511_v29, %v1534_v2 }
 0xc6c   :  { %v2772_v57 = vpop.eup %2771  ;;  %v1561_v9 = vmul.f32 1.442695, %v1550_v4 }
 0xc6d   :  { %v1577_v59 = vsel %vm921_vm3, %v2772_v57, 0.0 }
 0xc6e   :  { %1578 = vadd.xlane.f32.xlu1 %v1577_v59 }
 0xc71   :  { %v1537_v0 = vpop.xlane.xlu0 %1536 }
 0xc72   :  { %v1551_v1 = vsub.f32 %v1514_v32, %v1537_v0  ;;  %v2495_v0 = vld [vmem:[%s3874_s10 + $0x1c] sm:$0xf] }
 0xc74   :  { %v1563_v3 = vmul.f32 1.442695, %v1551_v1  ;;  %v1753_v1 = vsel %vm754_vm0, %v2495_v0, 0 }
 0xc76   :  { %1619 = vrot.lane.b32.xlu2 %v3654_v63, %s2838_s23 }
 0xc79   :  { %v1540_v48 = vpop.xlane.xlu1 %1539 }
 0xc7a   :  { %v1552_v61 = vsub.f32 %v1516_v34, %v1540_v48  ;;  %1617 = vrot.lane.b32.xlu0 %v3660_v8, %s2838_s23 }
 0xc7c   :  { %v1565_v62 = vmul.f32 1.442695, %v1552_v61 }
 0xc7e   :  { %2773 = vpow2.f32 %v1565_v62  ;;  %v2493_v62 = vld [vmem:[%s3874_s10 + $0x18] sm:$0xf] }
 0xc7f   :  { %2775 = vpow2.f32 %v1563_v3 }
 0xc80   :  { %2777 = vpow2.f32 %v1561_v9 }
 0xc81   :  { %v1543_v10 = vpop.xlane.xlu2 %1542 }
 0xc82   :  { %v1553_v8 = vsub.f32 %v1519_v37, %v1543_v10 }
 0xc84   :  { %v3703_v58 = vpop.eup %2773  ;;  %v1567_v13 = vmul.f32 1.442695, %v1553_v8 }
 0xc85   :  { %v1586_v49 = vsel %vm921_vm3, %v3703_v58, 0.0  ;;  %v2776_v12 = vpop.eup %2775 }
 0xc86   :  { %1587 = vadd.xlane.f32.xlu1 %v1586_v49  ;;  %v1583_v14 = vsel %vm921_vm3, %v2776_v12, 0.0  ;;  %v2778_v15 = vpop.eup %2777 }
 0xc87   :  { %v1580_v17 = vsel %vm921_vm3, %v2778_v15, 0.0 }
 0xc89   :  { %v1546_v7 = vpop.xlane.xlu0 %1545 }
 0xc8a   :  { %v1554_v63 = vsub.f32 %v1521_v40, %v1546_v7 }
 0xc8c   :  { %v1569_v11 = vmul.f32 1.442695, %v1554_v63 }
 0xc8e   :  { %2779 = vpow2.f32 %v1569_v11 }
 0xc8f   :  { %2781 = vpow2.f32 %v1567_v13 }
 0xc91   :  { %v1616_v29 = vpop.permute.xlu1 %1615 }
 0xc94   :  { %v2780_v5 = vpop.eup %2779 }
 0xc95   :  { %v1592_v52 = vsel %vm921_vm3, %v2780_v5, 0.0  ;;  %v2782_v6 = vpop.eup %2781 }
 0xc96   :  { %v1589_v18 = vsel %vm921_vm3, %v2782_v6, 0.0 }
 0xc9f   :  { %1584 = vadd.xlane.f32.xlu2 %v1583_v14  ;;  %v2718_v14 = vld [vmem:[%s3875_s11 + $0x1] ss:$0 sm:$0xff] }
 0xca4   :  { %1581 = vadd.xlane.f32.xlu0 %v1580_v17 }
 0xca7   :  { %1593 = vadd.xlane.f32.xlu2 %v1592_v52 }
 0xcac   :  { %1590 = vadd.xlane.f32.xlu0 %v1589_v18 }
 0xcd1   :  { %v1573_v20 = vpop.xlane.xlu2 %1572 }
 0xcd9   :  { %v1620_v21 = vpop.permute.xlu2 %1619  ;;  %v1576_v22 = vpop.xlane.xlu0 %1575 }
 0xcda   :  { %1644 = vmatpush.bf16.msra.mxu1 %v1620_v21  ;;  %2783 = vrcp.f32 %v1576_v22 }
 0xcdb   :  { %2785 = vrcp.f32 %v1573_v20 }
 0xce0   :  { %v2784_v24 = vpop.eup %2783 }
 0xce1   :  { %v2786_v26 = vpop.eup %2785  ;;  %v1604_v28 = vmul.f32 %v2784_v24, %v2770_v54  ;;  %v1579_v32 = vpop.xlane.xlu1 %1578  ;;  %v2489_v54 = vld [vmem:[%s3874_s10 + $0x10] sm:$0xf] }
 0xce2   :  { %v1603_v16 = vmul.f32 %v2786_v26, %v3693_v46  ;;  %2787 = vrcp.f32 %v1579_v32  ;;  %v1675_v55 = vsel %vm754_vm0, %v2489_v54, 0 }
 0xce3   :  { %1684 = vmatpush.bf16.msrb.mxu0 %v1675_v55 }
 0xce4   :  { %v1611_v30 = vpack.c.bf16 %v1604_v28, %v1603_v16 }
 0xce8   :  { %v2788_v33 = vpop.eup %2787 }
 0xce9   :  { %v1605_v23 = vmul.f32 %v2788_v33, %v2772_v57  ;;  %v1703_v57 = vsel %vm754_vm0, %v2491_v56, 0 }
 0xcea   :  { %1712 = vmatpush.bf16.msrb.mxu2 %v1703_v57 }
 0xcec   :  { %v1618_v25 = vpop.permute.xlu0 %1617 }
 0xced   :  { %1645 = vmatpush.bf16.msra.mxu1 %v1618_v25 }
 0xcee   :  { %1762 = vmatpush.bf16.msra.mxu2 %v1753_v1 }
 0xcf1   :  { %1646 = vmatpush.bf16.msra.mxu1 %v1616_v29 }
 0xcf4   :  { %2485 = vmatmul.msk.bf16.vlgmr.msra.gmra.mxu1 %vm921_vm3, %v1611_v30 }
 0xcf9   :  { %v1588_v38 = vpop.xlane.xlu1 %1587 }
 0xd12   :  { %v1585_v37 = vpop.xlane.xlu2 %1584 }
 0xd17   :  { %v1582_v19 = vpop.xlane.xlu0 %1581 }
 0xd18   :  { %2789 = vrcp.f32 %v1582_v19 }
 0xd19   :  { %2791 = vrcp.f32 %v1585_v37 }
 0xd1a   :  { %2793 = vrcp.f32 %v1588_v38  ;;  %v1594_v45 = vpop.xlane.xlu2 %1593 }
 0xd1e   :  { %v2790_v34 = vpop.eup %2789 }
 0xd1f   :  { %v1606_v36 = vmul.f32 %v2790_v34, %v2778_v15  ;;  %v2792_v40 = vpop.eup %2791  ;;  %v1591_v42 = vpop.xlane.xlu0 %1590 }
 0xd20   :  { %v2794_v31 = vpop.eup %2793  ;;  %v1607_v41 = vmul.f32 %v2792_v40, %v2776_v12  ;;  %2795 = vrcp.f32 %v1591_v42 }
 0xd21   :  { %v1612_v27 = vpack.c.bf16 %v1606_v36, %v1605_v23  ;;  %v1608_v35 = vmul.f32 %v2794_v31, %v3703_v58  ;;  %2797 = vrcp.f32 %v1594_v45  ;;  %v1728_v58 = vsel %vm754_vm0, %v2493_v62, 0 }
 0xd22   :  { %1737 = vmatpush.bf16.msra.mxu0 %v1728_v58  ;;  %v2719_v58 = vld [vmem:[%s3876_s12 + $0x1] ss:$0 sm:$0xff] }
 0xd23   :  { %2486 = vmatmul.msk.bf16.gmra.mxu1 %vm921_vm3, %v1612_v27  ;;  %v1613_v44 = vpack.c.bf16 %v1608_v35, %v1607_v41  ;;  %v2653_v35 = vld [vmem:[%s3878_s14 + $0x10] sm:$0xff] }
 0xd26   :  { %v2796_v46 = vpop.eup %2795 }
 0xd27   :  { %v2798_v39 = vpop.eup %2797  ;;  %v1609_v51 = vmul.f32 %v2796_v46, %v2782_v6 }
 0xd28   :  { %v1610_v43 = vmul.f32 %v2798_v39, %v2780_v5 }
 0xd2a   :  { %v1614_v53 = vpack.c.bf16 %v1610_v43, %v1609_v51 }
 0xd33   :  { %2487 = vmatmul.msk.bf16.gmra.mxu1 %vm921_vm3, %v1613_v44 }
 0xd43   :  { %2488 = vmatmul.msk.bf16.gmra.mxu1 %vm921_vm3, %v1614_v53 }
 0xd71   :  { %v1648_v59 = vpop.f32.mrf.mxu1 }
 0xd79   :  { %v1650_v48 = vpop.f32.mrf.mxu1 }
 0xd7a   :  { %v1668_v61 = vpack.c.bf16 %v1650_v48, %v1648_v59 }
 0xd7c   :  { %2490 = vmatmul.msk.bf16.vlgmr.msrb.gmra.mxu0 %vm750_vm1, %v1668_v61 }
 0xda0   :  { %v1653_v49 = vpop.f32.mrf.mxu1 }
 0xda8   :  { %v1655_v2 = vpop.f32.mrf.mxu1 }
 0xda9   :  { %v1696_v3 = vpack.c.bf16 %v1655_v2, %v1653_v49  ;;  %v2720_v2 = vld [vmem:[%s3877_s13 + $0x1] ss:$0 sm:$0xff] }
 0xdab   :  { %2492 = vmatmul.msk.bf16.vlgmr.msrb.gmra.mxu2 %vm750_vm1, %v1696_v3 }
 0xdb0   :  { %v1658_v4 = vpop.f32.mrf.mxu1 }
 0xdb8   :  { %v1660_v7 = vpop.f32.mrf.mxu1 }
 0xdb9   :  { %v1721_v63 = vpack.c.bf16 %v1660_v7, %v1658_v4 }
 0xdbb   :  { %2494 = vmatmul.msk.bf16.vlgmr.msra.gmra.mxu0 %vm750_vm1, %v1721_v63 }
 0xdc0   :  { %v1663_v9 = vpop.f32.mrf.mxu1 }
 0xdc8   :  { %v1665_v10 = vpop.f32.mrf.mxu1 }
 0xdc9   :  { %v1746_v11 = vpack.c.bf16 %v1665_v10, %v1663_v9 }
 0xdcb   :  { %2496 = vmatmul.msk.bf16.vlgmr.msra.gmra.mxu2 %vm750_vm1, %v1746_v11  ;;  %v2658_v11 = vld [vmem:[%s3880_s16 + $0x38] sm:$0xff] }
 0xdcc   :  { %1911 = vmatpush.bf16.msrb.mxu2 %v2658_v11 }
 0xdf9   :  { %v1686_v8 = vpop.f32.mrf.mxu0 }
 0xdfa   :  { %v1694_v17 = vadd.f32 %v2718_v14, %v1686_v8  ;;  %v2657_v8 = vld [vmem:[%s3880_s16 + $0x30] sm:$0xff] }
 0xdfb   :  { %1912 = vmatpush.bf16.msrb.mxu2 %v2657_v8 }
 0xe01   :  { %v1688_v13 = vpop.f32.mrf.mxu0 }
 0xe02   :  { %v1695_v21 = vadd.f32 %v2718_v14, %v1688_v13  ;;  %v2655_v13 = vld [vmem:[%s3880_s16 + $0x20] sm:$0xff] }
 0xe2e   :  { %v1714_v12 = vpop.f32.mrf.mxu2 }
 0xe2f   :  { %v1719_v52 = vadd.f32 %v1714_v12, %v1694_v17  ;;  %v2656_v12 = vld [vmem:[%s3880_s16 + $0x28] sm:$0xff] }
 0xe30   :  { %1913 = vmatpush.bf16.msrb.mxu2 %v2656_v12 }
 0xe34   :  { %1914 = vmatpush.bf16.msrb.mxu2 %v2655_v13 }
 0xe36   :  { %v1716_v15 = vpop.f32.mrf.mxu2 }
 0xe37   :  { %v1720_v25 = vadd.f32 %v1716_v15, %v1695_v21  ;;  %v2721_v15 = vld [vmem:[%s3879_s15 + $0x1] ss:$0 sm:$0xff] }
 0xe38   :  { %v1739_v5 = vpop.f32.mrf.mxu0  ;;  %v2722_v21 = vld [vmem:[%s3881_s17 + $0x1] ss:$0 sm:$0xff] }
 0xe39   :  { %v1744_v6 = vadd.f32 %v1739_v5, %v1719_v52 }
 0xe40   :  { %v1741_v24 = vpop.f32.mrf.mxu0 }
 0xe41   :  { %v1745_v28 = vadd.f32 %v1741_v24, %v1720_v25 }
 0xe4e   :  { %v1764_v18 = vpop.f32.mrf.mxu2 }
 0xe4f   :  { %v1769_v20 = vadd.f32 %v1764_v18, %v1744_v6 }
 0xe51   :  { %v1771_v22 = vadd.f32 %v1769_v20, %v3637_v47 }
 0xe53   :  { %v1773_v26 = vsel %vm814_vm2, %v1771_v22, 0.0 }
 0xe54   :  { %1774 = vadd.xlane.f32.xlu1 %v1773_v26 }
 0xe56   :  { %v1766_v29 = vpop.f32.mrf.mxu2 }
 0xe57   :  { %v1770_v16 = vadd.f32 %v1766_v29, %v1745_v28 }
 0xe59   :  { %v1772_v30 = vadd.f32 %v1770_v16, %v3639_v50  ;;  %v2654_v50 = vld [vmem:[%s3878_s14 + $0x18] sm:$0xff] }
 0xe5a   :  { %1857 = vmatpush.bf16.msrb.mxu0 %v2654_v50  ;;  %v2563_v50 = vld [vmem:[%s3884_s20 + $0x38] sm:$0xf0] }
 0xe5b   :  { %v1776_v32 = vsel %vm814_vm2, %v1772_v30, 0.0 }
 0xe5c   :  { %1777 = vadd.xlane.f32.xlu0 %v1776_v32 }
 0xe5e   :  { %1858 = vmatpush.bf16.msrb.mxu0 %v2653_v35  ;;  %v2555_v35 = vld [vmem:[%s3884_s20 + $0x30] sm:$0xf0] }
 0xec7   :  { %v1775_v19 = vpop.xlane.xlu1 %1774 }
 0xec8   :  { %v1779_v33 = vmul.f32 %v1775_v19, %v3577_v60 }
 0xeca   :  { %v1781_v34 = vsub.f32 %v1771_v22, %v1779_v33 }
 0xecc   :  { %v1783_v23 = vmul.f32 %v1781_v34, %v1781_v34 }
 0xece   :  { %v1785_v47 = vsel %vm814_vm2, %v1783_v23, 0.0 }
 0xecf   :  { %1786 = vadd.xlane.f32.xlu2 %v1785_v47  ;;  %v1778_v36 = vpop.xlane.xlu0 %1777 }
 0xed0   :  { %v1780_v37 = vmul.f32 %v1778_v36, %v3577_v60 }
 0xed2   :  { %v1782_v27 = vsub.f32 %v1772_v30, %v1780_v37 }
 0xed4   :  { %v1784_v38 = vmul.f32 %v1782_v27, %v1782_v27 }
 0xed6   :  { %v1788_v40 = vsel %vm814_vm2, %v1784_v38, 0.0 }
 0xed7   :  { %1789 = vadd.xlane.f32.xlu1 %v1788_v40  ;;  %v2664_v40 = vld [vmem:[%s3884_s20 + $0x2c] sm:$0xf] }
 0xf42   :  { %v1787_v31 = vpop.xlane.xlu2 %1786 }
 0xf43   :  { %v1791_v41 = vmul.f32 %v1787_v31, %v3577_v60  ;;  %v2566_v31 = vor.u32 %v2664_v40, %v2563_v50 }
 0xf45   :  { %v1793_v42 = vadd.f32 1e-05, %v1791_v41  ;;  %v2663_v41 = vld [vmem:[%s3884_s20 + $0x24] sm:$0xf]  ;;  %2087 = vmatpush.bf16.msra.mxu3 %v2566_v31 }
 0xf47   :  { %2799 = vrsqrt.f32 %v1793_v42  ;;  %vm1801_vm1 = vweird.f32 %v1793_v42 }
 0xf4a   :  { %v1790_v44 = vpop.xlane.xlu1 %1789 }
 0xf4b   :  { %v1792_v45 = vmul.f32 %v1790_v44, %v3577_v60  ;;  %v2558_v44 = vor.u32 %v2663_v41, %v2555_v35 }
 0xf4d   :  { %v2800_v46 = vpop.eup %2799  ;;  %v1794_v39 = vadd.f32 1e-05, %v1792_v45  ;;  %v2665_v45 = vld [vmem:[%s3884_s20 + $0x2c] sm:$0xf0]  ;;  %2059 = vmatpush.bf16.msrb.mxu1 %v2558_v44 }
 0xf4e   :  { %v1796_v51 = vmul.f32 %v2800_v46, %v1793_v42  ;;  %vm1802_vm0 = vweird.f32 %v2800_v46  ;;  %v2553_v42 = vld [vmem:[%s3884_s20 + $0x20] sm:$0xf] }
 0xf4f   :  { %2801 = vrsqrt.f32 %v1794_v39  ;;  %vm1803_vm5 = vmor %vm1801_vm1, %vm1802_vm0  ;;  %vm1811_vm7 = vweird.f32 %v1794_v39 }
 0xf50   :  { %v1797_v43 = vmul.f32 %v2800_v46, %v1796_v51  ;;  %v2554_v51 = vor.u32 %v2665_v45, %v2553_v42 }
 0xf52   :  { %v1798_v53 = vmul.f32 0.5, %v1797_v43  ;;  %2045 = vmatpush.bf16.msra.mxu0 %v2554_v51 }
 0xf54   :  { %v1799_v54 = vsub.f32 1.5, %v1798_v53 }
 0xf55   :  { %v2802_v55 = vpop.eup %2801 }
 0xf56   :  { %v1800_v56 = vmul.f32 %v2800_v46, %v1799_v54  ;;  %v1806_v57 = vmul.f32 %v2802_v55, %v1794_v39  ;;  %vm1812_vm6 = vweird.f32 %v2802_v55  ;;  %v2666_v39 = vld [vmem:[%s3884_s20 + $0x34] sm:$0xf0] }
 0xf57   :  { %vm1813_vm8 = vmor %vm1811_vm7, %vm1812_vm6 }
 0xf58   :  { %v1807_v59 = vmul.f32 %v2802_v55, %v1806_v57  ;;  %v1804_v48 = vsel %vm1803_vm5, %v2800_v46, %v1800_v56  ;;  %v2561_v46 = vld [vmem:[%s3884_s20 + $0x28] sm:$0xf]  ;;  %v2661_v56 = vld [vmem:[%s3884_s20 + $0xc] sm:$0xf0]  ;;  %v2659_v57 = vld [vmem:[%s3884_s20 + $0x4] sm:$0xf] }
 0xf59   :  { %v1815_v49 = vmul.f32 %v1804_v48, %v1781_v34  ;;  %v2562_v43 = vor.u32 %v2666_v39, %v2561_v46  ;;  %v2539_v48 = vld [vmem:[%s3884_s20 + $0x10] sm:$0xf0] }
 0xf5a   :  { %v1808_v61 = vmul.f32 0.5, %v1807_v59 }
 0xf5b   :  { %v1820_v3 = vmul.f32 %v2719_v58, %v1815_v49  ;;  %2073 = vmatpush.bf16.msra.mxu2 %v2562_v43  ;;  %v2542_v49 = vor.u32 %v2659_v57, %v2539_v48 }
 0xf5c   :  { %v1809_v62 = vsub.f32 1.5, %v1808_v61  ;;  %v2545_v61 = vld [vmem:[%s3884_s20 + $0x8] sm:$0xf] }
 0xf5d   :  { %v1825_v63 = vadd.f32 %v2720_v2, %v1820_v3  ;;  %2060 = vmatpush.bf16.msrb.mxu1 %v2542_v49 }
 0xf5e   :  { %v1810_v0 = vmul.f32 %v2802_v55, %v1809_v62  ;;  %v2662_v62 = vld [vmem:[%s3884_s20 + $0x14] sm:$0xf0] }
 0xf60   :  { %v1814_v1 = vsel %vm1813_vm8, %v2802_v55, %v1810_v0  ;;  %v2537_v55 = vld [vmem:[%s3884_s20] sm:$0xf]  ;;  %v2546_v0 = vor.u32 %v2662_v62, %v2545_v61 }
 0xf61   :  { %v1816_v4 = vmul.f32 %v1814_v1, %v1782_v27  ;;  %v2538_v59 = vor.u32 %v2661_v56, %v2537_v55  ;;  %v2660_v1 = vld [vmem:[%s3884_s20 + $0xc] sm:$0xf] }
 0xf62   :  { %2074 = vmatpush.bf16.msra.mxu2 %v2546_v0 }
 0xf63   :  { %v1821_v7 = vmul.f32 %v2719_v58, %v1816_v4  ;;  %2046 = vmatpush.bf16.msra.mxu0 %v2538_v59 }
 0xf65   :  { %v1826_v9 = vadd.f32 %v2720_v2, %v1821_v7  ;;  %v2547_v2 = vld [vmem:[%s3884_s20 + $0x18] sm:$0xf0] }
 0xf66   :  { %v2550_v3 = vor.u32 %v2660_v1, %v2547_v2 }
 0xf67   :  { %v1827_v10 = vpack.c.bf16 %v1826_v9, %v1825_v63 }
 0xf68   :  { %2088 = vmatpush.bf16.msra.mxu3 %v2550_v3 }
 0xf69   :  { %2509 = vmatmul.msk.bf16.vlgmr.msrb.gmra.mxu0 %vm814_vm2, %v1827_v10 }
 0xfe6   :  { %v1860_v14 = vpop.f32.mrf.mxu0 }
 0xfe7   :  { %v1861_v5 = vadd.f32 %v2721_v15, %v1860_v14 }
 0xfe9   :  { %v1865_v6 = vmax.f32 %v1861_v5, 0.0 }
 0xfee   :  { %v1862_v17 = vpop.f32.mrf.mxu0 }
 0xfef   :  { %v1863_v52 = vadd.f32 %v2721_v15, %v1862_v17 }
 0xff1   :  { %v1866_v18 = vmax.f32 %v1863_v52, 0.0 }
 0xff3   :  { %v1867_v20 = vpack.c.bf16 %v1866_v18, %v1865_v6 }
 0xff5   :  { %2534 = vmatmul.msk.bf16.vlgmr.msrb.gmra.mxu2 %vm921_vm3, %v1867_v20 }
0x1078   :  { %v1916_v22 = vpop.f32.mrf.mxu2 }
0x1079   :  { %v1917_v24 = vadd.f32 %v2722_v21, %v1916_v22  ;;  %v2724_v22 = vld [vmem:[%s3883_s19 + $0x1] ss:$0 sm:$0xff]  ;;  %s2840_s19 = smov [#allocation2]  }
0x107b   :  { %v1921_v25 = vadd.f32 %v1917_v24, %v1825_v63 }
0x107d   :  { %v1923_v26 = vsel %vm814_vm2, %v1921_v25, 0.0 }
0x107e   :  { %1924 = vadd.xlane.f32.xlu0 %v1923_v26 }
0x1080   :  { %v1918_v28 = vpop.f32.mrf.mxu2 }
0x1081   :  { %v1919_v29 = vadd.f32 %v2722_v21, %v1918_v28 }
0x1083   :  { %v1922_v16 = vadd.f32 %v1919_v29, %v1826_v9 }
0x1085   :  { %v1926_v30 = vsel %vm814_vm2, %v1922_v16, 0.0 }
0x1086   :  { %1927 = vadd.xlane.f32.xlu2 %v1926_v30  ;;  %v1986_v30 = vld [vmem:[%s3885_s21] sm:$0xf]  ;;  %s2107_s21 = sshll.u32 %s2840_s19, 4  ;;  %s2108_s21 = int_to_ptr.vmem [resolvable:$true] %s2107_s21 }
0x10f1   :  { %v1925_v32 = vpop.xlane.xlu0 %1924 }
0x10f2   :  { %v1929_v19 = vmul.f32 %v1925_v32, %v3577_v60  ;;  %v1988_v32 = vperm.slane %v1986_v30, 0 }
0x10f4   :  { %v3785_v33 = vsub.f32 %v1921_v25, %v1929_v19  ;;  %v1989_v19 = vperm.slane %v1986_v30, 1 }
0x10f6   :  { %v1933_v34 = vmul.f32 %v3785_v33, %v3785_v33 }
0x10f8   :  { %v1935_v23 = vsel %vm814_vm2, %v1933_v34, 0.0 }
0x10f9   :  { %v1928_v47 = vpop.xlane.xlu2 %1927  ;;  %1936 = vadd.xlane.f32.xlu1 %v1935_v23 }
0x10fa   :  { %v1930_v36 = vmul.f32 %v1928_v47, %v3577_v60 }
0x10fc   :  { %v3791_v37 = vsub.f32 %v1922_v16, %v1930_v36  ;;  %v1990_v36 = vperm.slane %v1986_v30, 2 }
0x10fe   :  { %v1934_v27 = vmul.f32 %v3791_v37, %v3791_v37 }
0x1100   :  { %v1938_v38 = vsel %vm814_vm2, %v1934_v27, 0.0 }
0x1101   :  { %1939 = vadd.xlane.f32.xlu0 %v1938_v38 }
0x116c   :  { %v1937_v53 = vpop.xlane.xlu1 %1936 }
0x116d   :  { %v1941_v54 = vmul.f32 %v1937_v53, %v3577_v60 }
0x116f   :  { %v1943_v58 = vadd.f32 1e-05, %v1941_v54 }
0x1171   :  { %2803 = vrsqrt.f32 %v1943_v58  ;;  %vm1951_vm9 = vweird.f32 %v1943_v58 }
0x1174   :  { %v1940_v4 = vpop.xlane.xlu0 %1939 }
0x1175   :  { %v1942_v7 = vmul.f32 %v1940_v4, %v3577_v60  ;;  %v2723_v60 = vld [vmem:[%s3882_s18 + $0x1] ss:$0 sm:$0xff] }
0x1177   :  { %v2804_v63 = vpop.eup %2803  ;;  %v1944_v9 = vadd.f32 1e-05, %v1942_v7 }
0x1178   :  { %v1946_v10 = vmul.f32 %v2804_v63, %v1943_v58  ;;  %vm1952_vm3 = vweird.f32 %v2804_v63 }
0x1179   :  { %2805 = vrsqrt.f32 %v1944_v9  ;;  %vm1953_vm10 = vmor %vm1951_vm9, %vm1952_vm3  ;;  %vm1961_vm12 = vweird.f32 %v1944_v9 }
0x117a   :  { %v1947_v11 = vmul.f32 %v2804_v63, %v1946_v10 }
0x117c   :  { %v1948_v8 = vmul.f32 0.5, %v1947_v11 }
0x117e   :  { %v1949_v12 = vsub.f32 1.5, %v1948_v8 }
0x117f   :  { %v2806_v13 = vpop.eup %2805 }
0x1180   :  { %v1950_v14 = vmul.f32 %v2804_v63, %v1949_v12  ;;  %v1956_v15 = vmul.f32 %v2806_v13, %v1944_v9  ;;  %vm1962_vm11 = vweird.f32 %v2806_v13 }
0x1181   :  { %vm1963_vm13 = vmor %vm1961_vm12, %vm1962_vm11 }
0x1182   :  { %v1957_v5 = vmul.f32 %v2806_v13, %v1956_v15  ;;  %v1954_v17 = vsel %vm1953_vm10, %v2804_v63, %v1950_v14 }
0x1183   :  { %v1965_v18 = vmul.f32 %v1954_v17, %v3785_v33 }
0x1184   :  { %v1958_v52 = vmul.f32 0.5, %v1957_v5 }
0x1185   :  { %v1970_v24 = vmul.f32 %v2723_v60, %v1965_v18 }
0x1186   :  { %v1959_v6 = vsub.f32 1.5, %v1958_v52 }
0x1187   :  { %v1975_v28 = vadd.f32 %v2724_v22, %v1970_v24 }
0x1188   :  { %v1960_v20 = vmul.f32 %v2806_v13, %v1959_v6 }
0x118a   :  { %v1964_v21 = vsel %vm1963_vm13, %v2806_v13, %v1960_v20 }
0x118b   :  { %v1966_v25 = vmul.f32 %v1964_v21, %v3791_v37  ;;  %v1991_v37 = vperm.slane %v1986_v30, 3 }
0x118d   :  { %v1971_v26 = vmul.f32 %v2723_v60, %v1966_v25 }
0x118f   :  { %v1976_v29 = vadd.f32 %v2724_v22, %v1971_v26 }
0x1191   :  { %v1977_v16 = vpack.c.bf16 %v1976_v29, %v1975_v28 }
0x1193   :  { %2567 = vmatmul.msk.bf16.vlgmr.msra.gmra.mxu0 %vm814_vm2, %v1977_v16  ;;  %2568 = vmatmul.msk.bf16.vlgmr.msrb.gmra.mxu1 %vm814_vm2, %v1977_v16 }
0x1194   :  { %2569 = vmatmul.msk.bf16.vlgmr.msra.gmra.mxu2 %vm814_vm2, %v1977_v16  ;;  %2570 = vmatmul.msk.bf16.vlgmr.msra.gmra.mxu3 %vm814_vm2, %v1977_v16 }
0x1210   :  { %v2048_v33 = vpop.f32.mrf.mxu0  ;;  %v2062_v34 = vpop.f32.mrf.mxu1 }
0x1211   :  { %v2049_v23 = vadd.f32 %v2048_v33, %v1988_v32  ;;  %v2063_v47 = vadd.f32 %v2062_v34, %v1989_v19 }
0x1213   :  { %2095 = vst [vmem:[#allocation2] sm:$0xff] %v2049_v23 }
0x1214   :  { %2096 = vst [vmem:[#allocation2 + $0x8] sm:$0xff] %v2063_v47 }
0x1217   :  { %v2076_v27 = vpop.f32.mrf.mxu2  ;;  %v2090_v38 = vpop.f32.mrf.mxu3 }
0x1218   :  { %v2077_v40 = vadd.f32 %v2076_v27, %v1990_v36  ;;  %v2091_v50 = vadd.f32 %v2090_v38, %v1991_v37  ;;  %v2050_v31 = vpop.f32.mrf.mxu0  ;;  %v2064_v41 = vpop.f32.mrf.mxu1 }
0x1219   :  { %v2051_v35 = vadd.f32 %v2050_v31, %v1988_v32  ;;  %v2065_v42 = vadd.f32 %v2064_v41, %v1989_v19 }
0x121a   :  { %2097 = vst [vmem:[#allocation2 + $0x10] sm:$0xff] %v2077_v40 }
0x121b   :  { %2098 = vst [vmem:[#allocation2 + $0x18] sm:$0xff] %v2091_v50 }
0x121c   :  { %2099 = vst [vmem:[#allocation2 + $0x20] sm:$0xff] %v2051_v35 }
0x121d   :  { %2100 = vst [vmem:[#allocation2 + $0x28] sm:$0xff] %v2065_v42 }
0x121f   :  { %v2078_v44 = vpop.f32.mrf.mxu2  ;;  %v2092_v45 = vpop.f32.mrf.mxu3 }
0x1220   :  { %v2079_v46 = vadd.f32 %v2078_v44, %v1990_v36  ;;  %v2093_v39 = vadd.f32 %v2092_v45, %v1991_v37 }
0x1222   :  { %2101 = vst [vmem:[#allocation2 + $0x30] sm:$0xff] %v2079_v46 }
0x1223   :  { %2102 = vst [vmem:[#allocation2 + $0x38] sm:$0xff] %v2093_v39 }
0x1224   :  { %2115 = dma.vmem_to_hbm [thread:$0]  %s2108_s21, 1024, %s2110_s2, [#allocation3], %s2841_s27, %s2841_s27, %s2842_s3  }
0x1225   :  { %2831 = dma.done.wait [#allocation3], 1024  }
0x1226   :  { %2832 = vsyncadd [#allocation3], 4294966272 }
0x1227   :  { %2120 = vsyncpa [#allocation3], 1 }

</bundles_post_ra>
